<compile_context>
chip_gen: v7x
topology: tpu7x:2x2x1
jax: 0.10.0
libtpu: 0.0.40
codegen_flags: <defaults>
</compile_context>

<pallas_src>
import functools

import numpy as np
import jax
import jax.numpy as jnp
from jax import lax
from jax.experimental import pallas as pl
from jax.experimental.pallas import tpu as pltpu

NEG = -1.0e9  # finite stand-in for -inf


def _inside_kernel(lens_ref, arc_ref, arcT_ref, sibl_ref, sibr_ref, out_ref,
                   s_i, s_s, s_c, s_cT, s_cR, *, multiroot):
    S = arc_ref.shape[1]
    b = pl.program_id(0)
    wi = pl.program_id(1)          # width index; actual span width is w = wi + 1
    w = wi + 1
    L = lens_ref[b]

    rI = lax.broadcasted_iota(jnp.int32, (S, S), 0)   # sublane index: span start k / row i
    cI = lax.broadcasted_iota(jnp.int32, (S, S), 1)   # lane index:    position r / col j
    kcol = lax.broadcasted_iota(jnp.int32, (S, 1), 0)
    eye = rI == cI

    @pl.when(wi == 0)                                 # new batch element: reset the charts
    def _init():
        s_i[...] = jnp.full((S, S), NEG, jnp.float32)
        s_s[...] = jnp.full((S, S), NEG, jnp.float32)
        s_c[...] = jnp.where(eye, 0.0, NEG).astype(jnp.float32)
        s_cT[...] = jnp.where(eye, 0.0, NEG).astype(jnp.float32)
        # lane-shifted mirror of the complete chart: s_cR[k, r] == s_c[k, r-1]
        s_cR[...] = jnp.where(cI == rI + 1, 0.0, NEG).astype(jnp.float32)

    def lane_lse(vals, msk):                          # (S, S) -> (S, 1)
        v = jnp.where(msk, vals, NEG)
        mx = jnp.max(v, axis=1, keepdims=True)
        return mx + jnp.log(jnp.sum(jnp.exp(v - mx), axis=1, keepdims=True))

    def logaddexp(a, c):
        mx = jnp.maximum(a, c)
        return mx + jnp.log(jnp.exp(a - mx) + jnp.exp(c - mx))

    def diag_col(mat, off):                           # col[k] = mat[k, k + off] (0 if OOR)
        return jnp.sum(jnp.where(cI == rI + off, mat, 0.0), axis=1, keepdims=True)

    def col_to_row(col, off=0):                       # (S,1) -> (1,S): row[j] = col[j - off]
        return jnp.sum(jnp.where(cI == rI + off, col, 0.0), axis=0, keepdims=True)

    def split2(x):
        # 2-way bf16 split (~16 mantissa bits); exact through the 0/1 one-hot matmul.
        # NEG=-1e9 reconstructs to within ~4e3 and therefore stays effectively -inf.
        h = x.astype(jnp.bfloat16)
        return h, (x - h.astype(jnp.float32)).astype(jnp.bfloat16)

    @pl.when(w <= L)       # logZ = s_c[0, L]; widths beyond the sentence length are dead
    def _width_step():
        mask_sup = cI == rI + w            # positions (k, k + w); also the row-shift one-hot
        mask_sub = rI == cI + w            # positions (k + w, k)
        valid = rI + w < S                 # sublane k is a real span start
        interior = (cI > rI) & (cI < rI + w) & valid
        span_lo = (cI >= rI) & (cI < rI + w) & valid
        span_hi = (cI > rI) & (cI <= rI + w) & valid

        Si0 = s_i[...]                     # s_i[k, r]
        Ss0 = s_s[...]                     # s_s[k, r]  (kept symmetric)
        C0 = s_c[...]                      # s_c[k, r]
        CT0 = s_cT[...]                    # s_c[r, k]
        CR0 = s_cR[...]                    # s_c[k, r-1]

        # ---- fused row shift: [Si|Ss|C|CT][k + w, :] -----------------------------------
        # NOTE: rows with k + w >= S come back as 0.0 (not NEG); every consumer below is
        # masked by `valid` / `mask_sup`, which keeps those stale rows out of the charts.
        pieces = [split2(x) for x in (Si0, Ss0, C0, CT0)]
        if S % 128 == 0:
            # one (S, 2S) @ (2S, 4S) bf16 dot: hi/lo split stacked along K, the four charts
            # along N -> fills the 256-wide MXU (v6e/v7x) and amortizes weight loads.
            rI2 = lax.broadcasted_iota(jnp.int32, (S, 2 * S), 0)
            cI2 = lax.broadcasted_iota(jnp.int32, (S, 2 * S), 1)
            A2 = ((cI2 == rI2 + w) | (cI2 == rI2 + w + S)).astype(jnp.bfloat16)
            X = jnp.concatenate(
                [jnp.concatenate([h for h, _ in pieces], axis=1),
                 jnp.concatenate([l for _, l in pieces], axis=1)], axis=0)
            Y = jnp.dot(A2, X, preferred_element_type=jnp.float32)
            Siw, Ssw, Cw, CTw = (Y[:, :S], Y[:, S:2 * S], Y[:, 2 * S:3 * S], Y[:, 3 * S:])
        else:
            # small / lane-unaligned S: per-chart shifts (no unaligned lane concatenation)
            P = mask_sup.astype(jnp.bfloat16)
            shifted = [jnp.dot(P, h, preferred_element_type=jnp.float32)
                       + jnp.dot(P, l, preferred_element_type=jnp.float32)
                       for h, l in pieces]
            Siw, Ssw, Cw, CTw = shifted

        arc = arc_ref[0]
        arcT = arcT_ref[0]
        arc_l = diag_col(arc, w)                     # s_arc[b, k, k+w]
        arc_r = diag_col(arcT, w)                    # s_arc[b, k+w, k]
        sibL = sibl_ref[0, 0].astype(jnp.float32)    # s_sib[b, dep=k,   head=k+w, sib=r]
        sibR = sibr_ref[0, 0].astype(jnp.float32)    # s_sib[b, dep=k+w, head=k,   sib=r]

        # I(k+w -> k): incomplete span, head k+w, dependent k
        t_l = Siw + Ss0 + sibL
        base_l = jnp.where(kcol == 0, 0.0, diag_col(C0, w - 1))   # s_c[k, k+w-1]
        il = logaddexp(lane_lse(t_l, interior), base_l) + arc_l

        # I(k -> k+w): incomplete span, head k, dependent k+w (no sibling terms when k == 0)
        t_r = Si0 + Ssw + sibR
        base_r = diag_col(Cw, 1)                                  # s_c[k+w, k+1]
        ir = logaddexp(lane_lse(t_r, interior & (rI > 0)), base_r) + arc_r

        # S(k, k+w): two adjacent complete spans; s_cR holds the lane-shifted complete chart
        slr = lane_lse(CR0 + Cw, span_hi)

        # C(k+w -> k) / C(k -> k+w): use the s_i diagonals freshly written this width
        cl = lane_lse(CT0 + jnp.where(eye, il, Siw), span_lo)
        cr = lane_lse(jnp.where(mask_sup, ir, Si0) + CTw, span_hi)
        if not multiroot:
            cr = jnp.where((kcol == 0) & (w != L), NEG, cr)

        # scatter the new diagonals back (one read-modify-write per chart)
        # TODO(synk): if vld/vst saturates at S >= 128, tile k into 32-64 sublane chunks here.
        il_row = col_to_row(il)
        slr_row = col_to_row(slr)
        cl_row = col_to_row(cl)
        cr_row = col_to_row(cr)
        s_i[...] = jnp.where(mask_sup, ir, jnp.where(mask_sub, il_row, Si0))
        s_s[...] = jnp.where(mask_sup, slr, jnp.where(mask_sub, slr_row, Ss0))
        s_c[...] = jnp.where(mask_sup, cr, jnp.where(mask_sub, cl_row, C0))
        s_cT[...] = jnp.where(mask_sup, cl, jnp.where(mask_sub, cr_row, CT0))
        # keep the lane-shifted mirror in sync: s_cR[k, k+w+1] = cr[k], s_cR[k+w, k+1] = cl[k]
        s_cR[...] = jnp.where(cI == rI + w + 1, cr,
                              jnp.where(rI == cI + (w - 1), col_to_row(cl, 1), CR0))

    @pl.when(wi == pl.num_programs(1) - 1)           # only row 0 of the complete chart is needed
    def _write_out():
        out_ref[...] = s_c[pl.ds(0, 1), :].reshape(1, 1, S)


@functools.partial(jax.jit, static_argnames=("multiroot", "sib_dtype"))
def _inside_row0(s_arc, s_sib, lens, multiroot=False, sib_dtype=jnp.float32):
    """Returns s_c[:, 0, :] of the inside chart, shape (B, S)."""
    B, S, _ = s_arc.shape
    s_arc = s_arc.astype(jnp.float32)
    arcT = jnp.swapaxes(s_arc, 1, 2)
    lens = jnp.clip(lens.astype(jnp.int32), 0, S - 1)

    # Diagonal-major relayout of s_sib so each width w is one rectangular (S, S) stripe:
    #   sib_l[b, w, k, :] = s_sib[b, k, k+w, :]   (dep = k,   head = k+w)
    #   sib_r[b, w, k, :] = s_sib[b, k+w, k, :]   (dep = k+w, head = k)
    # One-off O(S^3) HBM->HBM gather; the kernel streams one (S, S) stripe pair per width.
    # NOTE: set sib_dtype=jnp.bfloat16 to halve sib HBM traffic (verify tolerance first).
    idx = jnp.arange(S)
    dep = jnp.broadcast_to(idx[None, :], (S, S))
    head = jnp.clip(idx[:, None] + idx[None, :], 0, S - 1)
    sib = s_sib.astype(sib_dtype)
    sib_l = sib[:, dep, head, :]
    sib_r = sib[:, head, dep, :]

    W = max(S - 1, 1)
    kernel = functools.partial(_inside_kernel, multiroot=multiroot)

    def arc_map(b, w, lens_ref):
        return (b, 0, 0)

    def sib_map(b, w, lens_ref):
        # widths beyond the sentence length re-request the same stripe -> DMA deduped
        return (b, jnp.minimum(w + 1, lens_ref[b]), 0, 0)

    def out_map(b, w, lens_ref):
        return (b, 0, 0)

    # NOTE: production parsers should bucket S (e.g. 128/256) so lanes/MXU stay full;
    # padding widths beyond the true length are skipped by the in-kernel length gate.
    grid_spec = pltpu.PrefetchScalarGridSpec(
        num_scalar_prefetch=1,
        grid=(B, W),
        in_specs=[
            pl.BlockSpec((1, S, S), arc_map),        # s_arc      (resident per batch element)
            pl.BlockSpec((1, S, S), arc_map),        # s_arc^T
            pl.BlockSpec((1, 1, S, S), sib_map),     # left-sibling stripe for width w
            pl.BlockSpec((1, 1, S, S), sib_map),     # right-sibling stripe for width w
        ],
        out_specs=pl.BlockSpec((1, 1, S), out_map),
        scratch_shapes=[pltpu.VMEM((S, S), jnp.float32) for _ in range(5)],
    )

    sib_bytes = np.dtype(sib_dtype).itemsize
    resident = (2 * 2 * S * S * 4            # arc + arc^T, double buffered
                + 2 * 2 * S * S * sib_bytes  # two streamed sib stripes, double buffered
                + 5 * S * S * 4              # chart scratch
                + 2 * S * 4)                 # output block
    need = 4 * resident + (4 << 20)          # headroom: fused-shift operands + lse temporaries
    # generation-safe cap (well below v7x's 64 MiB physical VMEM per TensorCore)
    vmem_limit = int(min(max(need, 32 << 20), 48 << 20))

    row0 = pl.pallas_call(
        kernel,
        out_shape=jax.ShapeDtypeStruct((B, 1, S), jnp.float32),
        grid_spec=grid_spec,
        compiler_params=pltpu.CompilerParams(
            dimension_semantics=("parallel", "arbitrary"),
            vmem_limit_bytes=vmem_limit,
        ),
    )(lens, s_arc, arcT, sib_l, sib_r)
    return row0[:, 0, :]


class CRF2oDependency:
    """JAX/Pallas port of supar's CRF2oDependency forward pass (inside algorithm on TPU)."""

    def __init__(self, multiroot=False):
        self.multiroot = multiroot

    def inside(self, s_arc, s_sib, mask, cands=None):
        B, S = mask.shape
        lens = jnp.sum(mask.astype(jnp.int32), axis=1)
        if cands is not None:  # partial annotation: restrict candidate arcs before the chart kernel
            m = mask.at[:, 0].set(True)
            pair = m[:, :, None] & m[:, None, :]
            c = cands.at[:, 0].set(-1)
            allowed = ((c[:, :, None] == jnp.arange(S)[None, None, :]) | (c[:, :, None] < 0)) & pair
            s_arc = jnp.where(allowed, s_arc, NEG)
        row0 = _inside_row0(s_arc, s_sib, lens, multiroot=self.multiroot)   # (B, S)
        logZ_b = jnp.take_along_axis(row0, lens[:, None], axis=1)[:, 0]
        return jnp.sum(logZ_b)

    def __call__(self, scores, mask, target=None, mbr=False, partial=False):
        s_arc, s_sib = scores
        logZ = self.inside(s_arc, s_sib, mask)
        if mbr:
            # TODO(synk): MBR marginals = d logZ / d s_arc need the outside pass (custom VJP); not implemented.
            raise NotImplementedError("mbr marginals require the outside algorithm")
        marginals = s_arc
        if target is None:
            return marginals
        arcs, sibs = target
        if partial:
            score = self.inside(s_arc, s_sib, mask, cands=arcs)
        else:
            arc_sel = jnp.take_along_axis(s_arc, arcs[..., None], axis=-1)[..., 0]
            sib_sel = jnp.take_along_axis(s_sib, sibs[..., None], axis=-1)[..., 0]
            score = jnp.sum(jnp.where(mask, arc_sel, 0.0)) + jnp.sum(jnp.where(sibs > 0, sib_sel, 0.0))
        loss = (logZ - score) / jnp.sum(mask)
        return loss, marginals


def _inside_reference(s_arc, s_sib, lens, multiroot=False):
    """Direct NumPy transcription (float64, true -inf) of the PyTorch stripe-based inside()."""
    B, S, _ = s_arc.shape
    A = np.transpose(s_arc, (2, 1, 0)).astype(np.float64)      # [head, dep, b]
    SB = np.transpose(s_sib, (2, 1, 3, 0)).astype(np.float64)  # [head, dep, sib, b]
    NI = -np.inf
    s_i = np.full((S, S, B), NI)
    s_s = np.full((S, S, B), NI)
    s_c = np.full((S, S, B), NI)
    for t in range(S):
        s_c[t, t] = 0.0

    def lse(x, axis):
        m = np.max(x, axis=axis, keepdims=True)
        ms = np.where(np.isfinite(m), m, 0.0)
        with np.errstate(divide="ignore"):
            return np.squeeze(m, axis) + np.log(np.sum(np.exp(x - ms), axis=axis))

    for w in range(1, S):
        n = S - w
        il = np.empty((n, w, B)); ir = np.empty((n, w, B))
        slr = np.empty((n, w, B)); cl = np.empty((n, w, B)); cr = np.empty((n, w, B))
        for k in range(n):
            for m in range(w):
                il[k, m] = s_i[w + k, 1 + k + m] + s_s[1 + k + m, k] + SB[w + k, k, 1 + k + m]
        il0 = np.stack([s_c[w + k, w + k] + s_c[k, w - 1 + k] for k in range(n)], axis=0)
        il0[0] = 0.0
        il[:, -1] = il0
        ilv = lse(il, 1)
        for k in range(n):
            s_i[w + k, k] = ilv[k] + A[w + k, k]
        for k in range(n):
            for m in range(w):
                ir[k, m] = s_i[k, k + m] + s_s[k + m, w + k] + SB[k, w + k, k + m]
        ir[0] = NI
        ir0 = np.stack([s_c[k, k] + s_c[w + k, 1 + k] for k in range(n)], axis=0)
        ir[:, 0] = ir0
        irv = lse(ir, 1)
        for k in range(n):
            s_i[k, w + k] = irv[k] + A[k, w + k]
        for k in range(n):
            for m in range(w):
                slr[k, m] = s_c[k, k + m] + s_c[w + k, 1 + k + m]
        slrv = lse(slr, 1)
        for k in range(n):
            s_s[w + k, k] = slrv[k]
            s_s[k, w + k] = slrv[k]
        for k in range(n):
            for m in range(w):
                cl[k, m] = s_c[k + m, k] + s_i[w + k, k + m]
        clv = lse(cl, 1)
        for k in range(n):
            s_c[w + k, k] = clv[k]
        for k in range(n):
            for m in range(w):
                cr[k, m] = s_i[k, 1 + k + m] + s_c[1 + k + m, w + k]
        crv = lse(cr, 1)
        for k in range(n):
            s_c[k, w + k] = crv[k]
        if not multiroot:
            for bb in range(B):
                if lens[bb] != w:
                    s_c[0, w, bb] = NI
    return np.array([s_c[0, lens[bb], bb] for bb in range(B)])


if __name__ == "__main__":
    B, S = 2, 16
    key = jax.random.PRNGKey(0)
    k1, k2, k3, k4 = jax.random.split(key, 4)
    s_arc = jax.random.normal(k1, (B, S, S), dtype=jnp.float32)
    s_sib = jax.random.normal(k2, (B, S, S, S), dtype=jnp.float32)
    sent_lens = jnp.array([S - 1, 5], dtype=jnp.int32)
    pos = jnp.arange(S)[None, :]
    mask = (pos <= sent_lens[:, None]) & (pos > 0)          # first column (root) is False
    arcs = jax.random.randint(k3, (B, S), 0, S)
    sibs = jax.random.randint(k4, (B, S, S), 0, S)

    crf = CRF2oDependency(multiroot=False)
    loss, marginals = crf((s_arc, s_sib), mask, target=(arcs, sibs), mbr=False)
    loss, marginals = jax.block_until_ready((loss, marginals))

    # cross-check the Pallas inside() against a NumPy transcription of the PyTorch code
    lens = jnp.sum(mask.astype(jnp.int32), axis=1)
    row0 = jax.block_until_ready(_inside_row0(s_arc, s_sib, lens, multiroot=False))
    lens_np = np.asarray(lens)
    row0_np = np.asarray(row0)
    logZ_kernel = np.array([row0_np[bb, lens_np[bb]] for bb in range(B)])
    logZ_ref = _inside_reference(np.asarray(s_arc), np.asarray(s_sib), lens_np, multiroot=False)

    assert np.all(np.isfinite(logZ_kernel)), logZ_kernel
    assert np.allclose(logZ_kernel, logZ_ref, rtol=2e-3, atol=2e-3), (logZ_kernel, logZ_ref)
    assert np.isfinite(float(loss)), loss
    assert marginals.shape == (B, S, S)
    print("KERNEL_OK")
</pallas_src>

<mosaic_0001>
module attributes {stable_mosaic.version = 11 : i64} {
  func.func @_inside_kernel(%arg0: i32, %arg1: i32, %arg2: memref<2xi32, #tpu.memory_space<smem>>, %arg3: memref<1x16x16xf32, #tpu.memory_space<vmem>>, %arg4: memref<1x16x16xf32, #tpu.memory_space<vmem>>, %arg5: memref<1x1x16x16xf32, #tpu.memory_space<vmem>>, %arg6: memref<1x1x16x16xf32, #tpu.memory_space<vmem>>, %arg7: memref<1x1x16xf32, #tpu.memory_space<vmem>>, %arg8: memref<16x16xf32, #tpu.memory_space<vmem>>, %arg9: memref<16x16xf32, #tpu.memory_space<vmem>>, %arg10: memref<16x16xf32, #tpu.memory_space<vmem>>, %arg11: memref<16x16xf32, #tpu.memory_space<vmem>>, %arg12: memref<16x16xf32, #tpu.memory_space<vmem>>) attributes {dimension_semantics = [#tpu.dimension_semantics<parallel>, #tpu.dimension_semantics<arbitrary>], iteration_bounds = array<i64: 2, 15>, scalar_prefetch = 1 : i64, scratch_operands = 5 : i64, tpu.core_type = #tpu.core_type<tc>, window_params = [{transform_indices = @transform_0, window_bounds = array<i64: 1, 16, 16>}, {transform_indices = @transform_1, window_bounds = array<i64: 1, 16, 16>}, {transform_indices = @transform_2, window_bounds = array<i64: 1, 1, 16, 16>}, {transform_indices = @transform_3, window_bounds = array<i64: 1, 1, 16, 16>}, {transform_indices = @transform_4, window_bounds = array<i64: 1, 1, 16>}]} {
    %c1_i32 = arith.constant 1 : i32
    %0 = arith.addi %arg1, %c1_i32 : i32
    %1 = arith.index_cast %arg0 : i32 to index
    %2 = memref.load %arg2[%1] : memref<2xi32, #tpu.memory_space<smem>>
    %3 = tpu.iota {dimensions = array<i32: 0>} : vector<16x16xi32>
    %4 = tpu.iota {dimensions = array<i32: 1>} : vector<16x16xi32>
    %5 = tpu.iota {dimensions = array<i32: 0>} : vector<16x1xi32>
    %6 = arith.cmpi eq, %3, %4 : vector<16x16xi32>
    %c0_i32 = arith.constant 0 : i32
    %7 = arith.cmpi eq, %arg1, %c0_i32 : i32
    %8 = arith.extui %7 : i1 to i32
    %c0_i32_0 = arith.constant 0 : i32
    %9 = arith.cmpi ne, %8, %c0_i32_0 : i32
    scf.if %9 {
      %cst = arith.constant -1.000000e+09 : f32
      %16 = vector.broadcast %cst : f32 to vector<16x16xf32>
      %c0 = arith.constant 0 : index
      %c0_3 = arith.constant 0 : index
      %17 = vector.load %arg8[%c0, %c0_3] : memref<16x16xf32, #tpu.memory_space<vmem>>, vector<16x16xf32>
      tpu.vector_store %arg8[%c0, %c0_3], %16 {strides = array<i32>} : memref<16x16xf32, #tpu.memory_space<vmem>>, vector<16x16xf32>,
      %cst_4 = arith.constant -1.000000e+09 : f32
      %18 = vector.broadcast %cst_4 : f32 to vector<16x16xf32>
      %c0_5 = arith.constant 0 : index
      %c0_6 = arith.constant 0 : index
      %19 = vector.load %arg9[%c0_5, %c0_6] : memref<16x16xf32, #tpu.memory_space<vmem>>, vector<16x16xf32>
      tpu.vector_store %arg9[%c0_5, %c0_6], %18 {strides = array<i32>} : memref<16x16xf32, #tpu.memory_space<vmem>>, vector<16x16xf32>,
      %cst_7 = arith.constant 0.000000e+00 : f32
      %cst_8 = arith.constant -1.000000e+09 : f32
      %20 = vector.broadcast %cst_7 : f32 to vector<16x16xf32>
      %21 = vector.broadcast %cst_8 : f32 to vector<16x16xf32>
      %22 = arith.select %6, %20, %21 : vector<16x16xi1>, vector<16x16xf32>
      %c0_9 = arith.constant 0 : index
      %c0_10 = arith.constant 0 : index
      %23 = vector.load %arg10[%c0_9, %c0_10] : memref<16x16xf32, #tpu.memory_space<vmem>>, vector<16x16xf32>
      tpu.vector_store %arg10[%c0_9, %c0_10], %22 {strides = array<i32>} : memref<16x16xf32, #tpu.memory_space<vmem>>, vector<16x16xf32>,
      %cst_11 = arith.constant 0.000000e+00 : f32
      %cst_12 = arith.constant -1.000000e+09 : f32
      %24 = vector.broadcast %cst_11 : f32 to vector<16x16xf32>
      %25 = vector.broadcast %cst_12 : f32 to vector<16x16xf32>
      %26 = arith.select %6, %24, %25 : vector<16x16xi1>, vector<16x16xf32>
      %c0_13 = arith.constant 0 : index
      %c0_14 = arith.constant 0 : index
      %27 = vector.load %arg11[%c0_13, %c0_14] : memref<16x16xf32, #tpu.memory_space<vmem>>, vector<16x16xf32>
      tpu.vector_store %arg11[%c0_13, %c0_14], %26 {strides = array<i32>} : memref<16x16xf32, #tpu.memory_space<vmem>>, vector<16x16xf32>,
      %c1_i32_15 = arith.constant 1 : i32
      %28 = vector.broadcast %c1_i32_15 : i32 to vector<16x16xi32>
      %29 = arith.addi %3, %28 : vector<16x16xi32>
      %30 = arith.cmpi eq, %4, %29 : vector<16x16xi32>
      %cst_16 = arith.constant 0.000000e+00 : f32
      %cst_17 = arith.constant -1.000000e+09 : f32
      %31 = vector.broadcast %cst_16 : f32 to vector<16x16xf32>
      %32 = vector.broadcast %cst_17 : f32 to vector<16x16xf32>
      %33 = arith.select %30, %31, %32 : vector<16x16xi1>, vector<16x16xf32>
      %c0_18 = arith.constant 0 : index
      %c0_19 = arith.constant 0 : index
      %34 = vector.load %arg12[%c0_18, %c0_19] : memref<16x16xf32, #tpu.memory_space<vmem>>, vector<16x16xf32>
      tpu.vector_store %arg12[%c0_18, %c0_19], %33 {strides = array<i32>} : memref<16x16xf32, #tpu.memory_space<vmem>>, vector<16x16xf32>,
    } else {
    }
    %10 = arith.cmpi sle, %0, %2 : i32
    %11 = arith.extui %10 : i1 to i32
    %c0_i32_1 = arith.constant 0 : i32
    %12 = arith.cmpi ne, %11, %c0_i32_1 : i32
    scf.if %12 {
      %16 = vector.broadcast %0 : i32 to vector<16x16xi32>
      %17 = arith.addi %3, %16 : vector<16x16xi32>
      %18 = arith.cmpi eq, %4, %17 : vector<16x16xi32>
      %19 = vector.broadcast %0 : i32 to vector<16x16xi32>
      %20 = arith.addi %4, %19 : vector<16x16xi32>
      %21 = arith.cmpi eq, %3, %20 : vector<16x16xi32>
      %22 = vector.broadcast %0 : i32 to vector<16x16xi32>
      %23 = arith.addi %3, %22 : vector<16x16xi32>
      %c16_i32 = arith.constant 16 : i32
      %24 = vector.broadcast %c16_i32 : i32 to vector<16x16xi32>
      %25 = arith.cmpi slt, %23, %24 : vector<16x16xi32>
      %26 = arith.cmpi sgt, %4, %3 : vector<16x16xi32>
      %27 = vector.broadcast %0 : i32 to vector<16x16xi32>
      %28 = arith.addi %3, %27 : vector<16x16xi32>
      %29 = arith.cmpi slt, %4, %28 : vector<16x16xi32>
      %30 = arith.andi %26, %29 : vector<16x16xi1>
      %31 = arith.andi %30, %25 : vector<16x16xi1>
      %32 = arith.cmpi sge, %4, %3 : vector<16x16xi32>
      %33 = vector.broadcast %0 : i32 to vector<16x16xi32>
      %34 = arith.addi %3, %33 : vector<16x16xi32>
      %35 = arith.cmpi slt, %4, %34 : vector<16x16xi32>
      %36 = arith.andi %32, %35 : vector<16x16xi1>
      %37 = arith.andi %36, %25 : vector<16x16xi1>
      %38 = arith.cmpi sgt, %4, %3 : vector<16x16xi32>
      %39 = vector.broadcast %0 : i32 to vector<16x16xi32>
      %40 = arith.addi %3, %39 : vector<16x16xi32>
      %41 = arith.cmpi sle, %4, %40 : vector<16x16xi32>
      %42 = arith.andi %38, %41 : vector<16x16xi1>
      %43 = arith.andi %42, %25 : vector<16x16xi1>
      %c0 = arith.constant 0 : index
      %c0_3 = arith.constant 0 : index
      %44 = vector.load %arg8[%c0, %c0_3] : memref<16x16xf32, #tpu.memory_space<vmem>>, vector<16x16xf32>
      %c0_4 = arith.constant 0 : index
      %c0_5 = arith.constant 0 : index
      %45 = vector.load %arg9[%c0_4, %c0_5] : memref<16x16xf32, #tpu.memory_space<vmem>>, vector<16x16xf32>
      %c0_6 = arith.constant 0 : index
      %c0_7 = arith.constant 0 : index
      %46 = vector.load %arg10[%c0_6, %c0_7] : memref<16x16xf32, #tpu.memory_space<vmem>>, vector<16x16xf32>
      %c0_8 = arith.constant 0 : index
      %c0_9 = arith.constant 0 : index
      %47 = vector.load %arg11[%c0_8, %c0_9] : memref<16x16xf32, #tpu.memory_space<vmem>>, vector<16x16xf32>
      %c0_10 = arith.constant 0 : index
      %c0_11 = arith.constant 0 : index
      %48 = vector.load %arg12[%c0_10, %c0_11] : memref<16x16xf32, #tpu.memory_space<vmem>>, vector<16x16xf32>
      %49 = arith.truncf %44 : vector<16x16xf32> to vector<16x16xbf16>
      %50 = arith.extf %49 : vector<16x16xbf16> to vector<16x16xf32>
      %51 = arith.subf %44, %50 : vector<16x16xf32>
      %52 = arith.truncf %51 : vector<16x16xf32> to vector<16x16xbf16>
      %53 = arith.truncf %45 : vector<16x16xf32> to vector<16x16xbf16>
      %54 = arith.extf %53 : vector<16x16xbf16> to vector<16x16xf32>
      %55 = arith.subf %45, %54 : vector<16x16xf32>
      %56 = arith.truncf %55 : vector<16x16xf32> to vector<16x16xbf16>
      %57 = arith.truncf %46 : vector<16x16xf32> to vector<16x16xbf16>
      %58 = arith.extf %57 : vector<16x16xbf16> to vector<16x16xf32>
      %59 = arith.subf %46, %58 : vector<16x16xf32>
      %60 = arith.truncf %59 : vector<16x16xf32> to vector<16x16xbf16>
      %61 = arith.truncf %47 : vector<16x16xf32> to vector<16x16xbf16>
      %62 = arith.extf %61 : vector<16x16xbf16> to vector<16x16xf32>
      %63 = arith.subf %47, %62 : vector<16x16xf32>
      %64 = arith.truncf %63 : vector<16x16xf32> to vector<16x16xbf16>
      %65 = arith.extui %18 : vector<16x16xi1> to vector<16x16xi32>
      %66 = arith.sitofp %65 : vector<16x16xi32> to vector<16x16xf32>
      %67 = arith.truncf %66 : vector<16x16xf32> to vector<16x16xbf16>
      %cst = arith.constant dense<0.000000e+00> : vector<16x16xf32>
      %68 = tpu.matmul %67, %49, %cst {dimension_numbers = #tpu.dot_dimension_numbers<[1], [0], [0], [1], [0, 0, 1, 1], [], []>} : vector<16x16xbf16>, vector<16x16xbf16>, vector<16x16xf32> -> vector<16x16xf32>
      %cst_12 = arith.constant dense<0.000000e+00> : vector<16x16xf32>
      %69 = tpu.matmul %67, %52, %cst_12 {dimension_numbers = #tpu.dot_dimension_numbers<[1], [0], [0], [1], [0, 0, 1, 1], [], []>} : vector<16x16xbf16>, vector<16x16xbf16>, vector<16x16xf32> -> vector<16x16xf32>
      %70 = arith.addf %68, %69 : vector<16x16xf32>
      %cst_13 = arith.constant dense<0.000000e+00> : vector<16x16xf32>
      %71 = tpu.matmul %67, %53, %cst_13 {dimension_numbers = #tpu.dot_dimension_numbers<[1], [0], [0], [1], [0, 0, 1, 1], [], []>} : vector<16x16xbf16>, vector<16x16xbf16>, vector<16x16xf32> -> vector<16x16xf32>
      %cst_14 = arith.constant dense<0.000000e+00> : vector<16x16xf32>
      %72 = tpu.matmul %67, %56, %cst_14 {dimension_numbers = #tpu.dot_dimension_numbers<[1], [0], [0], [1], [0, 0, 1, 1], [], []>} : vector<16x16xbf16>, vector<16x16xbf16>, vector<16x16xf32> -> vector<16x16xf32>
      %73 = arith.addf %71, %72 : vector<16x16xf32>
      %cst_15 = arith.constant dense<0.000000e+00> : vector<16x16xf32>
      %74 = tpu.matmul %67, %57, %cst_15 {dimension_numbers = #tpu.dot_dimension_numbers<[1], [0], [0], [1], [0, 0, 1, 1], [], []>} : vector<16x16xbf16>, vector<16x16xbf16>, vector<16x16xf32> -> vector<16x16xf32>
      %cst_16 = arith.constant dense<0.000000e+00> : vector<16x16xf32>
      %75 = tpu.matmul %67, %60, %cst_16 {dimension_numbers = #tpu.dot_dimension_numbers<[1], [0], [0], [1], [0, 0, 1, 1], [], []>} : vector<16x16xbf16>, vector<16x16xbf16>, vector<16x16xf32> -> vector<16x16xf32>
      %76 = arith.addf %74, %75 : vector<16x16xf32>
      %cst_17 = arith.constant dense<0.000000e+00> : vector<16x16xf32>
      %77 = tpu.matmul %67, %61, %cst_17 {dimension_numbers = #tpu.dot_dimension_numbers<[1], [0], [0], [1], [0, 0, 1, 1], [], []>} : vector<16x16xbf16>, vector<16x16xbf16>, vector<16x16xf32> -> vector<16x16xf32>
      %cst_18 = arith.constant dense<0.000000e+00> : vector<16x16xf32>
      %78 = tpu.matmul %67, %64, %cst_18 {dimension_numbers = #tpu.dot_dimension_numbers<[1], [0], [0], [1], [0, 0, 1, 1], [], []>} : vector<16x16xbf16>, vector<16x16xbf16>, vector<16x16xf32> -> vector<16x16xf32>
      %79 = arith.addf %77, %78 : vector<16x16xf32>
      %c0_19 = arith.constant 0 : index
      %c0_20 = arith.constant 0 : index
      %c0_21 = arith.constant 0 : index
      %80 = vector.load %arg3[%c0_19, %c0_20, %c0_21] : memref<1x16x16xf32, #tpu.memory_space<vmem>>, vector<1x16x16xf32>
      %81 = vector.shape_cast %80 : vector<1x16x16xf32> to vector<16x16xf32>
      %c0_22 = arith.constant 0 : index
      %c0_23 = arith.constant 0 : index
      %c0_24 = arith.constant 0 : index
      %82 = vector.load %arg4[%c0_22, %c0_23, %c0_24] : memref<1x16x16xf32, #tpu.memory_space<vmem>>, vector<1x16x16xf32>
      %83 = vector.shape_cast %82 : vector<1x16x16xf32> to vector<16x16xf32>
      %84 = vector.broadcast %0 : i32 to vector<16x16xi32>
      %85 = arith.addi %3, %84 : vector<16x16xi32>
      %86 = arith.cmpi eq, %4, %85 : vector<16x16xi32>
      %cst_25 = arith.constant 0.000000e+00 : f32
      %87 = vector.broadcast %cst_25 : f32 to vector<16x16xf32>
      %88 = arith.select %86, %81, %87 : vector<16x16xi1>, vector<16x16xf32>
      %cst_26 = arith.constant dense<0.000000e+00> : vector<16xf32>
      %89 = vector.multi_reduction <add>, %88, %cst_26 [1] : vector<16x16xf32> to vector<16xf32>
      %90 = vector.shape_cast %89 : vector<16xf32> to vector<16x1xf32>
      %91 = vector.broadcast %0 : i32 to vector<16x16xi32>
      %92 = arith.addi %3, %91 : vector<16x16xi32>
      %93 = arith.cmpi eq, %4, %92 : vector<16x16xi32>
      %cst_27 = arith.constant 0.000000e+00 : f32
      %94 = vector.broadcast %cst_27 : f32 to vector<16x16xf32>
      %95 = arith.select %93, %83, %94 : vector<16x16xi1>, vector<16x16xf32>
      %cst_28 = arith.constant dense<0.000000e+00> : vector<16xf32>
      %96 = vector.multi_reduction <add>, %95, %cst_28 [1] : vector<16x16xf32> to vector<16xf32>
      %97 = vector.shape_cast %96 : vector<16xf32> to vector<16x1xf32>
      %c0_29 = arith.constant 0 : index
      %c0_30 = arith.constant 0 : index
      %c0_31 = arith.constant 0 : index
      %c0_32 = arith.constant 0 : index
      %98 = vector.load %arg5[%c0_29, %c0_30, %c0_31, %c0_32] : memref<1x1x16x16xf32, #tpu.memory_space<vmem>>, vector<1x1x16x16xf32>
      %99 = vector.shape_cast %98 : vector<1x1x16x16xf32> to vector<16x16xf32>
      %c0_33 = arith.constant 0 : index
      %c0_34 = arith.constant 0 : index
      %c0_35 = arith.constant 0 : index
      %c0_36 = arith.constant 0 : index
      %100 = vector.load %arg6[%c0_33, %c0_34, %c0_35, %c0_36] : memref<1x1x16x16xf32, #tpu.memory_space<vmem>>, vector<1x1x16x16xf32>
      %101 = vector.shape_cast %100 : vector<1x1x16x16xf32> to vector<16x16xf32>
      %102 = arith.addf %70, %45 : vector<16x16xf32>
      %103 = arith.addf %102, %99 : vector<16x16xf32>
      %c0_i32_37 = arith.constant 0 : i32
      %104 = vector.broadcast %c0_i32_37 : i32 to vector<16x1xi32>
      %105 = arith.cmpi eq, %5, %104 : vector<16x1xi32>
      %c1_i32_38 = arith.constant 1 : i32
      %106 = arith.subi %0, %c1_i32_38 : i32
      %107 = vector.broadcast %106 : i32 to vector<16x16xi32>
      %108 = arith.addi %3, %107 : vector<16x16xi32>
      %109 = arith.cmpi eq, %4, %108 : vector<16x16xi32>
      %cst_39 = arith.constant 0.000000e+00 : f32
      %110 = vector.broadcast %cst_39 : f32 to vector<16x16xf32>
      %111 = arith.select %109, %46, %110 : vector<16x16xi1>, vector<16x16xf32>
      %cst_40 = arith.constant dense<0.000000e+00> : vector<16xf32>
      %112 = vector.multi_reduction <add>, %111, %cst_40 [1] : vector<16x16xf32> to vector<16xf32>
      %113 = vector.shape_cast %112 : vector<16xf32> to vector<16x1xf32>
      %cst_41 = arith.constant 0.000000e+00 : f32
      %114 = vector.broadcast %cst_41 : f32 to vector<16x1xf32>
      %115 = arith.select %105, %114, %113 : vector<16x1xi1>, vector<16x1xf32>
      %cst_42 = arith.constant -1.000000e+09 : f32
      %116 = vector.broadcast %cst_42 : f32 to vector<16x16xf32>
      %117 = arith.select %31, %103, %116 : vector<16x16xi1>, vector<16x16xf32>
      %cst_43 = arith.constant dense<0xFF800000> : vector<16xf32>
      %118 = vector.multi_reduction <maximumf>, %117, %cst_43 [1] : vector<16x16xf32> to vector<16xf32>
      %119 = vector.shape_cast %118 : vector<16xf32> to vector<16x1xf32>
      %120 = vector.broadcast %119 : vector<16x1xf32> to vector<16x16xf32>
      %121 = arith.subf %117, %120 : vector<16x16xf32>
      %122 = math.exp %121 : vector<16x16xf32>
      %cst_44 = arith.constant dense<0.000000e+00> : vector<16xf32>
      %123 = vector.multi_reduction <add>, %122, %cst_44 [1] : vector<16x16xf32> to vector<16xf32>
      %124 = vector.shape_cast %123 : vector<16xf32> to vector<16x1xf32>
      %125 = math.log %124 : vector<16x1xf32>
      %126 = arith.addf %119, %125 : vector<16x1xf32>
      %127 = arith.maximumf %126, %115 : vector<16x1xf32>
      %128 = arith.subf %126, %127 : vector<16x1xf32>
      %129 = math.exp %128 : vector<16x1xf32>
      %130 = arith.subf %115, %127 : vector<16x1xf32>
      %131 = math.exp %130 : vector<16x1xf32>
      %132 = arith.addf %129, %131 : vector<16x1xf32>
      %133 = math.log %132 : vector<16x1xf32>
      %134 = arith.addf %127, %133 : vector<16x1xf32>
      %135 = arith.addf %134, %90 : vector<16x1xf32>
      %136 = arith.addf %44, %73 : vector<16x16xf32>
      %137 = arith.addf %136, %101 : vector<16x16xf32>
      %c1_i32_45 = arith.constant 1 : i32
      %138 = vector.broadcast %c1_i32_45 : i32 to vector<16x16xi32>
      %139 = arith.addi %3, %138 : vector<16x16xi32>
      %140 = arith.cmpi eq, %4, %139 : vector<16x16xi32>
      %cst_46 = arith.constant 0.000000e+00 : f32
      %141 = vector.broadcast %cst_46 : f32 to vector<16x16xf32>
      %142 = arith.select %140, %76, %141 : vector<16x16xi1>, vector<16x16xf32>
      %cst_47 = arith.constant dense<0.000000e+00> : vector<16xf32>
      %143 = vector.multi_reduction <add>, %142, %cst_47 [1] : vector<16x16xf32> to vector<16xf32>
      %144 = vector.shape_cast %143 : vector<16xf32> to vector<16x1xf32>
      %c0_i32_48 = arith.constant 0 : i32
      %145 = vector.broadcast %c0_i32_48 : i32 to vector<16x16xi32>
      %146 = arith.cmpi sgt, %3, %145 : vector<16x16xi32>
      %147 = arith.andi %31, %146 : vector<16x16xi1>
      %cst_49 = arith.constant -1.000000e+09 : f32
      %148 = vector.broadcast %cst_49 : f32 to vector<16x16xf32>
      %149 = arith.select %147, %137, %148 : vector<16x16xi1>, vector<16x16xf32>
      %cst_50 = arith.constant dense<0xFF800000> : vector<16xf32>
      %150 = vector.multi_reduction <maximumf>, %149, %cst_50 [1] : vector<16x16xf32> to vector<16xf32>
      %151 = vector.shape_cast %150 : vector<16xf32> to vector<16x1xf32>
      %152 = vector.broadcast %151 : vector<16x1xf32> to vector<16x16xf32>
      %153 = arith.subf %149, %152 : vector<16x16xf32>
      %154 = math.exp %153 : vector<16x16xf32>
      %cst_51 = arith.constant dense<0.000000e+00> : vector<16xf32>
      %155 = vector.multi_reduction <add>, %154, %cst_51 [1] : vector<16x16xf32> to vector<16xf32>
      %156 = vector.shape_cast %155 : vector<16xf32> to vector<16x1xf32>
      %157 = math.log %156 : vector<16x1xf32>
      %158 = arith.addf %151, %157 : vector<16x1xf32>
      %159 = arith.maximumf %158, %144 : vector<16x1xf32>
      %160 = arith.subf %158, %159 : vector<16x1xf32>
      %161 = math.exp %160 : vector<16x1xf32>
      %162 = arith.subf %144, %159 : vector<16x1xf32>
      %163 = math.exp %162 : vector<16x1xf32>
      %164 = arith.addf %161, %163 : vector<16x1xf32>
      %165 = math.log %164 : vector<16x1xf32>
      %166 = arith.addf %159, %165 : vector<16x1xf32>
      %167 = arith.addf %166, %97 : vector<16x1xf32>
      %168 = arith.addf %48, %76 : vector<16x16xf32>
      %cst_52 = arith.constant -1.000000e+09 : f32
      %169 = vector.broadcast %cst_52 : f32 to vector<16x16xf32>
      %170 = arith.select %43, %168, %169 : vector<16x16xi1>, vector<16x16xf32>
      %cst_53 = arith.constant dense<0xFF800000> : vector<16xf32>
      %171 = vector.multi_reduction <maximumf>, %170, %cst_53 [1] : vector<16x16xf32> to vector<16xf32>
      %172 = vector.shape_cast %171 : vector<16xf32> to vector<16x1xf32>
      %173 = vector.broadcast %172 : vector<16x1xf32> to vector<16x16xf32>
      %174 = arith.subf %170, %173 : vector<16x16xf32>
      %175 = math.exp %174 : vector<16x16xf32>
      %cst_54 = arith.constant dense<0.000000e+00> : vector<16xf32>
      %176 = vector.multi_reduction <add>, %175, %cst_54 [1] : vector<16x16xf32> to vector<16xf32>
      %177 = vector.shape_cast %176 : vector<16xf32> to vector<16x1xf32>
      %178 = math.log %177 : vector<16x1xf32>
      %179 = arith.addf %172, %178 : vector<16x1xf32>
      %180 = vector.shape_cast %135 : vector<16x1xf32> to vector<16x1xf32>
      %181 = vector.broadcast %180 : vector<16x1xf32> to vector<16x16xf32>
      %182 = arith.select %6, %181, %70 : vector<16x16xi1>, vector<16x16xf32>
      %183 = arith.addf %47, %182 : vector<16x16xf32>
      %cst_55 = arith.constant -1.000000e+09 : f32
      %184 = vector.broadcast %cst_55 : f32 to vector<16x16xf32>
      %185 = arith.select %37, %183, %184 : vector<16x16xi1>, vector<16x16xf32>
      %cst_56 = arith.constant dense<0xFF800000> : vector<16xf32>
      %186 = vector.multi_reduction <maximumf>, %185, %cst_56 [1] : vector<16x16xf32> to vector<16xf32>
      %187 = vector.shape_cast %186 : vector<16xf32> to vector<16x1xf32>
      %188 = vector.broadcast %187 : vector<16x1xf32> to vector<16x16xf32>
      %189 = arith.subf %185, %188 : vector<16x16xf32>
      %190 = math.exp %189 : vector<16x16xf32>
      %cst_57 = arith.constant dense<0.000000e+00> : vector<16xf32>
      %191 = vector.multi_reduction <add>, %190, %cst_57 [1] : vector<16x16xf32> to vector<16xf32>
      %192 = vector.shape_cast %191 : vector<16xf32> to vector<16x1xf32>
      %193 = math.log %192 : vector<16x1xf32>
      %194 = arith.addf %187, %193 : vector<16x1xf32>
      %195 = vector.shape_cast %167 : vector<16x1xf32> to vector<16x1xf32>
      %196 = vector.broadcast %195 : vector<16x1xf32> to vector<16x16xf32>
      %197 = arith.select %18, %196, %44 : vector<16x16xi1>, vector<16x16xf32>
      %198 = arith.addf %197, %79 : vector<16x16xf32>
      %cst_58 = arith.constant -1.000000e+09 : f32
      %199 = vector.broadcast %cst_58 : f32 to vector<16x16xf32>
      %200 = arith.select %43, %198, %199 : vector<16x16xi1>, vector<16x16xf32>
      %cst_59 = arith.constant dense<0xFF800000> : vector<16xf32>
      %201 = vector.multi_reduction <maximumf>, %200, %cst_59 [1] : vector<16x16xf32> to vector<16xf32>
      %202 = vector.shape_cast %201 : vector<16xf32> to vector<16x1xf32>
      %203 = vector.broadcast %202 : vector<16x1xf32> to vector<16x16xf32>
      %204 = arith.subf %200, %203 : vector<16x16xf32>
      %205 = math.exp %204 : vector<16x16xf32>
      %cst_60 = arith.constant dense<0.000000e+00> : vector<16xf32>
      %206 = vector.multi_reduction <add>, %205, %cst_60 [1] : vector<16x16xf32> to vector<16xf32>
      %207 = vector.shape_cast %206 : vector<16xf32> to vector<16x1xf32>
      %208 = math.log %207 : vector<16x1xf32>
      %209 = arith.addf %202, %208 : vector<16x1xf32>
      %c0_i32_61 = arith.constant 0 : i32
      %210 = vector.broadcast %c0_i32_61 : i32 to vector<16x1xi32>
      %211 = arith.cmpi eq, %5, %210 : vector<16x1xi32>
      %212 = arith.cmpi ne, %0, %2 : i32
      %213 = vector.broadcast %212 : i1 to vector<16x1xi1>
      %214 = arith.andi %211, %213 : vector<16x1xi1>
      %cst_62 = arith.constant -1.000000e+09 : f32
      %215 = vector.broadcast %cst_62 : f32 to vector<16x1xf32>
      %216 = arith.select %214, %215, %209 : vector<16x1xi1>, vector<16x1xf32>
      %c0_i32_63 = arith.constant 0 : i32
      %217 = vector.broadcast %c0_i32_63 : i32 to vector<16x16xi32>
      %218 = arith.addi %3, %217 : vector<16x16xi32>
      %219 = arith.cmpi eq, %4, %218 : vector<16x16xi32>
      %cst_64 = arith.constant 0.000000e+00 : f32
      %220 = vector.shape_cast %135 : vector<16x1xf32> to vector<16x1xf32>
      %221 = vector.broadcast %220 : vector<16x1xf32> to vector<16x16xf32>
      %222 = vector.broadcast %cst_64 : f32 to vector<16x16xf32>
      %223 = arith.select %219, %221, %222 : vector<16x16xi1>, vector<16x16xf32>
      %cst_65 = arith.constant dense<0.000000e+00> : vector<16xf32>
      %224 = vector.multi_reduction <add>, %223, %cst_65 [0] : vector<16x16xf32> to vector<16xf32>
      %225 = vector.shape_cast %224 : vector<16xf32> to vector<1x16xf32>
      %c0_i32_66 = arith.constant 0 : i32
      %226 = vector.broadcast %c0_i32_66 : i32 to vector<16x16xi32>
      %227 = arith.addi %3, %226 : vector<16x16xi32>
      %228 = arith.cmpi eq, %4, %227 : vector<16x16xi32>
      %cst_67 = arith.constant 0.000000e+00 : f32
      %229 = vector.shape_cast %179 : vector<16x1xf32> to vector<16x1xf32>
      %230 = vector.broadcast %229 : vector<16x1xf32> to vector<16x16xf32>
      %231 = vector.broadcast %cst_67 : f32 to vector<16x16xf32>
      %232 = arith.select %228, %230, %231 : vector<16x16xi1>, vector<16x16xf32>
      %cst_68 = arith.constant dense<0.000000e+00> : vector<16xf32>
      %233 = vector.multi_reduction <add>, %232, %cst_68 [0] : vector<16x16xf32> to vector<16xf32>
      %234 = vector.shape_cast %233 : vector<16xf32> to vector<1x16xf32>
      %c0_i32_69 = arith.constant 0 : i32
      %235 = vector.broadcast %c0_i32_69 : i32 to vector<16x16xi32>
      %236 = arith.addi %3, %235 : vector<16x16xi32>
      %237 = arith.cmpi eq, %4, %236 : vector<16x16xi32>
      %cst_70 = arith.constant 0.000000e+00 : f32
      %238 = vector.shape_cast %194 : vector<16x1xf32> to vector<16x1xf32>
      %239 = vector.broadcast %238 : vector<16x1xf32> to vector<16x16xf32>
      %240 = vector.broadcast %cst_70 : f32 to vector<16x16xf32>
      %241 = arith.select %237, %239, %240 : vector<16x16xi1>, vector<16x16xf32>
      %cst_71 = arith.constant dense<0.000000e+00> : vector<16xf32>
      %242 = vector.multi_reduction <add>, %241, %cst_71 [0] : vector<16x16xf32> to vector<16xf32>
      %243 = vector.shape_cast %242 : vector<16xf32> to vector<1x16xf32>
      %c0_i32_72 = arith.constant 0 : i32
      %244 = vector.broadcast %c0_i32_72 : i32 to vector<16x16xi32>
      %245 = arith.addi %3, %244 : vector<16x16xi32>
      %246 = arith.cmpi eq, %4, %245 : vector<16x16xi32>
      %cst_73 = arith.constant 0.000000e+00 : f32
      %247 = vector.shape_cast %216 : vector<16x1xf32> to vector<16x1xf32>
      %248 = vector.broadcast %247 : vector<16x1xf32> to vector<16x16xf32>
      %249 = vector.broadcast %cst_73 : f32 to vector<16x16xf32>
      %250 = arith.select %246, %248, %249 : vector<16x16xi1>, vector<16x16xf32>
      %cst_74 = arith.constant dense<0.000000e+00> : vector<16xf32>
      %251 = vector.multi_reduction <add>, %250, %cst_74 [0] : vector<16x16xf32> to vector<16xf32>
      %252 = vector.shape_cast %251 : vector<16xf32> to vector<1x16xf32>
      %253 = vector.shape_cast %225 : vector<1x16xf32> to vector<1x16xf32>
      %254 = vector.broadcast %253 : vector<1x16xf32> to vector<16x16xf32>
      %255 = arith.select %21, %254, %44 : vector<16x16xi1>, vector<16x16xf32>
      %256 = vector.shape_cast %167 : vector<16x1xf32> to vector<16x1xf32>
      %257 = vector.broadcast %256 : vector<16x1xf32> to vector<16x16xf32>
      %258 = arith.select %18, %257, %255 : vector<16x16xi1>, vector<16x16xf32>
      %c0_75 = arith.constant 0 : index
      %c0_76 = arith.constant 0 : index
      %259 = vector.load %arg8[%c0_75, %c0_76] : memref<16x16xf32, #tpu.memory_space<vmem>>, vector<16x16xf32>
      tpu.vector_store %arg8[%c0_75, %c0_76], %258 {strides = array<i32>} : memref<16x16xf32, #tpu.memory_space<vmem>>, vector<16x16xf32>,
      %260 = vector.shape_cast %234 : vector<1x16xf32> to vector<1x16xf32>
      %261 = vector.broadcast %260 : vector<1x16xf32> to vector<16x16xf32>
      %262 = arith.select %21, %261, %45 : vector<16x16xi1>, vector<16x16xf32>
      %263 = vector.shape_cast %179 : vector<16x1xf32> to vector<16x1xf32>
      %264 = vector.broadcast %263 : vector<16x1xf32> to vector<16x16xf32>
      %265 = arith.select %18, %264, %262 : vector<16x16xi1>, vector<16x16xf32>
      %c0_77 = arith.constant 0 : index
      %c0_78 = arith.constant 0 : index
      %266 = vector.load %arg9[%c0_77, %c0_78] : memref<16x16xf32, #tpu.memory_space<vmem>>, vector<16x16xf32>
      tpu.vector_store %arg9[%c0_77, %c0_78], %265 {strides = array<i32>} : memref<16x16xf32, #tpu.memory_space<vmem>>, vector<16x16xf32>,
      %267 = vector.shape_cast %243 : vector<1x16xf32> to vector<1x16xf32>
      %268 = vector.broadcast %267 : vector<1x16xf32> to vector<16x16xf32>
      %269 = arith.select %21, %268, %46 : vector<16x16xi1>, vector<16x16xf32>
      %270 = vector.shape_cast %216 : vector<16x1xf32> to vector<16x1xf32>
      %271 = vector.broadcast %270 : vector<16x1xf32> to vector<16x16xf32>
      %272 = arith.select %18, %271, %269 : vector<16x16xi1>, vector<16x16xf32>
      %c0_79 = arith.constant 0 : index
      %c0_80 = arith.constant 0 : index
      %273 = vector.load %arg10[%c0_79, %c0_80] : memref<16x16xf32, #tpu.memory_space<vmem>>, vector<16x16xf32>
      tpu.vector_store %arg10[%c0_79, %c0_80], %272 {strides = array<i32>} : memref<16x16xf32, #tpu.memory_space<vmem>>, vector<16x16xf32>,
      %274 = vector.shape_cast %252 : vector<1x16xf32> to vector<1x16xf32>
      %275 = vector.broadcast %274 : vector<1x16xf32> to vector<16x16xf32>
      %276 = arith.select %21, %275, %47 : vector<16x16xi1>, vector<16x16xf32>
      %277 = vector.shape_cast %194 : vector<16x1xf32> to vector<16x1xf32>
      %278 = vector.broadcast %277 : vector<16x1xf32> to vector<16x16xf32>
      %279 = arith.select %18, %278, %276 : vector<16x16xi1>, vector<16x16xf32>
      %c0_81 = arith.constant 0 : index
      %c0_82 = arith.constant 0 : index
      %280 = vector.load %arg11[%c0_81, %c0_82] : memref<16x16xf32, #tpu.memory_space<vmem>>, vector<16x16xf32>
      tpu.vector_store %arg11[%c0_81, %c0_82], %279 {strides = array<i32>} : memref<16x16xf32, #tpu.memory_space<vmem>>, vector<16x16xf32>,
      %281 = vector.broadcast %0 : i32 to vector<16x16xi32>
      %282 = arith.addi %3, %281 : vector<16x16xi32>
      %c1_i32_83 = arith.constant 1 : i32
      %283 = vector.broadcast %c1_i32_83 : i32 to vector<16x16xi32>
      %284 = arith.addi %282, %283 : vector<16x16xi32>
      %285 = arith.cmpi eq, %4, %284 : vector<16x16xi32>
      %c1_i32_84 = arith.constant 1 : i32
      %286 = arith.subi %0, %c1_i32_84 : i32
      %287 = vector.broadcast %286 : i32 to vector<16x16xi32>
      %288 = arith.addi %4, %287 : vector<16x16xi32>
      %289 = arith.cmpi eq, %3, %288 : vector<16x16xi32>
      %c1_i32_85 = arith.constant 1 : i32
      %290 = vector.broadcast %c1_i32_85 : i32 to vector<16x16xi32>
      %291 = arith.addi %3, %290 : vector<16x16xi32>
      %292 = arith.cmpi eq, %4, %291 : vector<16x16xi32>
      %cst_86 = arith.constant 0.000000e+00 : f32
      %293 = vector.shape_cast %194 : vector<16x1xf32> to vector<16x1xf32>
      %294 = vector.broadcast %293 : vector<16x1xf32> to vector<16x16xf32>
      %295 = vector.broadcast %cst_86 : f32 to vector<16x16xf32>
      %296 = arith.select %292, %294, %295 : vector<16x16xi1>, vector<16x16xf32>
      %cst_87 = arith.constant dense<0.000000e+00> : vector<16xf32>
      %297 = vector.multi_reduction <add>, %296, %cst_87 [0] : vector<16x16xf32> to vector<16xf32>
      %298 = vector.shape_cast %297 : vector<16xf32> to vector<1x16xf32>
      %299 = vector.shape_cast %298 : vector<1x16xf32> to vector<1x16xf32>
      %300 = vector.broadcast %299 : vector<1x16xf32> to vector<16x16xf32>
      %301 = arith.select %289, %300, %48 : vector<16x16xi1>, vector<16x16xf32>
      %302 = vector.shape_cast %216 : vector<16x1xf32> to vector<16x1xf32>
      %303 = vector.broadcast %302 : vector<16x1xf32> to vector<16x16xf32>
      %304 = arith.select %285, %303, %301 : vector<16x16xi1>, vector<16x16xf32>
      %c0_88 = arith.constant 0 : index
      %c0_89 = arith.constant 0 : index
      %305 = vector.load %arg12[%c0_88, %c0_89] : memref<16x16xf32, #tpu.memory_space<vmem>>, vector<16x16xf32>
      tpu.vector_store %arg12[%c0_88, %c0_89], %304 {strides = array<i32>} : memref<16x16xf32, #tpu.memory_space<vmem>>, vector<16x16xf32>,
    } else {
    }
    %c14_i32 = arith.constant 14 : i32
    %13 = arith.cmpi eq, %arg1, %c14_i32 : i32
    %14 = arith.extui %13 : i1 to i32
    %c0_i32_2 = arith.constant 0 : i32
    %15 = arith.cmpi ne, %14, %c0_i32_2 : i32
    scf.if %15 {
      %c0 = arith.constant 0 : index
      %c0_3 = arith.constant 0 : index
      %16 = vector.load %arg10[%c0, %c0_3] : memref<16x16xf32, #tpu.memory_space<vmem>>, vector<1x16xf32>
      %17 = vector.shape_cast %16 : vector<1x16xf32> to vector<1x1x16xf32>
      %c0_4 = arith.constant 0 : index
      %c0_5 = arith.constant 0 : index
      %c0_6 = arith.constant 0 : index
      %18 = vector.load %arg7[%c0_4, %c0_5, %c0_6] : memref<1x1x16xf32, #tpu.memory_space<vmem>>, vector<1x1x16xf32>
      tpu.vector_store %arg7[%c0_4, %c0_5, %c0_6], %17 {strides = array<i32>} : memref<1x1x16xf32, #tpu.memory_space<vmem>>, vector<1x1x16xf32>,
    } else {
    }
    return
  }
  func.func @transform_0(%arg0: i32, %arg1: i32, %arg2: memref<2xi32, #tpu.memory_space<smem>>) -> (i32, i32, i32) {
    %c0_i32 = arith.constant 0 : i32
    %c0_i32_0 = arith.constant 0 : i32
    %c0_i32_1 = arith.constant 0 : i32
    return %arg0, %c0_i32, %c0_i32_0 : i32, i32, i32
  }
  func.func @transform_1(%arg0: i32, %arg1: i32, %arg2: memref<2xi32, #tpu.memory_space<smem>>) -> (i32, i32, i32) {
    %c0_i32 = arith.constant 0 : i32
    %c0_i32_0 = arith.constant 0 : i32
    %c0_i32_1 = arith.constant 0 : i32
    return %arg0, %c0_i32, %c0_i32_0 : i32, i32, i32
  }
  func.func @transform_2(%arg0: i32, %arg1: i32, %arg2: memref<2xi32, #tpu.memory_space<smem>>) -> (i32, i32, i32, i32) {
    %c1_i32 = arith.constant 1 : i32
    %0 = arith.addi %arg1, %c1_i32 : i32
    %1 = arith.index_cast %arg0 : i32 to index
    %2 = memref.load %arg2[%1] : memref<2xi32, #tpu.memory_space<smem>>
    %3 = arith.minsi %0, %2 : i32
    %c0_i32 = arith.constant 0 : i32
    %c0_i32_0 = arith.constant 0 : i32
    %c0_i32_1 = arith.constant 0 : i32
    return %arg0, %3, %c0_i32, %c0_i32_0 : i32, i32, i32, i32
  }
  func.func @transform_3(%arg0: i32, %arg1: i32, %arg2: memref<2xi32, #tpu.memory_space<smem>>) -> (i32, i32, i32, i32) {
    %c1_i32 = arith.constant 1 : i32
    %0 = arith.addi %arg1, %c1_i32 : i32
    %1 = arith.index_cast %arg0 : i32 to index
    %2 = memref.load %arg2[%1] : memref<2xi32, #tpu.memory_space<smem>>
    %3 = arith.minsi %0, %2 : i32
    %c0_i32 = arith.constant 0 : i32
    %c0_i32_0 = arith.constant 0 : i32
    %c0_i32_1 = arith.constant 0 : i32
    return %arg0, %3, %c0_i32, %c0_i32_0 : i32, i32, i32, i32
  }
  func.func @transform_4(%arg0: i32, %arg1: i32, %arg2: memref<2xi32, #tpu.memory_space<smem>>) -> (i32, i32, i32) {
    %c0_i32 = arith.constant 0 : i32
    %c0_i32_0 = arith.constant 0 : i32
    %c0_i32_1 = arith.constant 0 : i32
    return %arg0, %c0_i32, %c0_i32_0 : i32, i32, i32
  }
}

</mosaic_0001>

<bundles_post_ra>
// kernel: _inside_row0.1
= control target key start
LH: loop header
LB: loop body
LE: loop exit
PB: predicated region body
PF: predicated region fallthrough
CT: control target
= control target key end

     0   :  { %s2360_s0 = inlined_call_operand.vmem [shape: s32[2], index: 0, kind: input, shape index: {}]   ;;  %s2361_s1 = inlined_call_operand.vmem [shape: f32[2,16,16], index: 1, kind: input, shape index: {}]   ;;  %s2362_s2 = inlined_call_operand.vmem [shape: f32[2,16,16], index: 2, kind: input, shape index: {}]   ;;  %s2363_s3 = inlined_call_operand.vmem [shape: f32[2,16,16,16], index: 3, kind: input, shape index: {}]   ;;  %s2364_s4 = inlined_call_operand.vmem [shape: f32[2,16,16,16], index: 4, kind: input, shape index: {}]   ;;  %s2365_s5 = inlined_call_operand.hbm [shape: f32[2,1,16], index: 5, kind: output, shape index: {}]  }
   0x1   :  { %2374 = sst [smem:[#allocation19_spill]] %s2361_s1  ;;  %s10_s20 = sshll.u32 %s2360_s0, 4  ;;  %s11_s20 = int_to_ptr.vmem [resolvable:$true] %s10_s20 }
   0x2   :  { %2375 = sst [smem:[#allocation20_spill]] %s2362_s2  ;;  %s1535_s21 = scalar_lea.vmem %s11_s20, 16 }
   0x3   :  { %p1536_p0 = scmp.ne.s32.totalorder %s11_s20, %s1535_s21  ;;  %p1540_p1 = scmp.lt.s32.totalorder %s11_s20, %s11_s20 }
   0x4   :  { %p1541_p2 = scmp.lt.s32.totalorder %s1535_s21, %s1535_s21 }
   0x6   :  { %p1542_p3 = por %p1541_p2, %p1540_p1 }
   0x8   :  { %p1543_p4 = pnand %p1542_p3, %p1536_p0 }
   0xa   :  { %1546 = shalt.err (!%p1543_p4)  }
   0xb   :  { %s1645_s22 = smov [#allocation8]  }
   0xc   :  { %13 = dma.vmem_to_smem %s11_s20, 16, %s1645_s22, [#allocation7] }
   0xd   :  { %1607 = dma.done.wait [#allocation7], 16 }
   0xe   :  { %1608 = vsyncadd [#allocation7], 4294967280 }
   0xf   :  { %15 = sfence }
  0x10   :  { %16 = vsyncpa [#allocation10], 0 }
  0x11   :  { %18 = vsyncpa [#allocation10 + $0x1], 0  ;;  %s1683_s23 = smov 0   ;;  %s1685_s24 = smov 0  }
  0x12   :  { %s1687_s0 = smov 0   ;;  %s1689_s25 = smov 0  }
  0x13   :  { %s1691_s26 = smov 0   ;;  %s1693_s27 = smov 0  }
  0x14   :  { %s1695_s28 = smov 0   ;;  %s1697_s29 = smov 0  }
  0x15 LB: > { %2376 = sst [smem:[#allocation13_spill]] %s1623_s0  ;;  %s1291_s30 = sadd.s32 4294967295, %s1643_s29   ;;  %s1643_s29 = sphi %s1697_s29, %s24_s29   ;;  %s1639_s28 = sphi %s1695_s28, %s2407_s28   ;;  %s1635_s27 = sphi %s1693_s27, %s2406_s27   ;;  %s1631_s26 = sphi %s1691_s26, %s2405_s26   ;;  %s1627_s25 = sphi %s1689_s25, %s2404_s25   ;;  %s1623_s0 = sphi %s1687_s0, %s2403_s0   ;;  %s1619_s24 = sphi %s1685_s24, %s2409_s24   ;;  %s1615_s23 = sphi %s1683_s23, %s2408_s23  }
  0x16   : > { %2377 = sst [smem:[#allocation14_spill]] %s1635_s27  ;;  %s1292_s6 = sadd.s32 4294967294, %s1643_s29  }
  0x17   : > { %2378 = sst [smem:[#allocation15_spill]] %s1639_s28  ;;  %s33_s7 = sadd.s32 1, %s1635_s27 }
  0x18   : > { %p34_p5 = scmp.ge.s32.totalorder %s33_s7, 15  ;;  %s36_s8 = sadd.s32 1, %s1639_s28 }
  0x19   : > { %p177_p6 = scmp.ne.s32.totalorder %s1623_s0, %s1619_s24  ;;  %p178_p7 = scmp.eq.s32.totalorder %s1291_s30, 29 }
  0x1a   : > { %s2411_s7 = smov (%p34_p5, %s33_s7), 0  ;;  %s2413_s8 = smov (!%p34_p5, %s36_s8), %s1639_s28 }
  0x1b   : > { %2379 = sst [smem:[#allocation16_spill]] %s2411_s7  ;;  %p1732_p8 = por %p178_p7, %p177_p6 }
  0x1c   : > { %p183_p9 = scmp.ne.s32.totalorder %s1619_s24, %s1615_s23  ;;  %p38_p10 = scmp.ge.s32.totalorder %s2413_s8, 2 }
  0x1d   : > { %p184_p11 = scmp.eq.s32.totalorder %s1292_s6, 29  ;;  %p1295_p12 = scmp.ge.s32.totalorder %s1643_s29, 1 }
  0x1e   : > { %p258_p13 = scmp.lt.s32.totalorder %s1643_s29, 31  ;;  %s2415_s8 = smov (%p38_p10, %s2413_s8), 0 }
  0x1f   : > { %2381 = sst [smem:[#allocation17_spill]] %s2415_s8  ;;  %p1742_p0 = por %p184_p11, %p183_p9 }
  0x20   : > { %p259_p1 = pnand %p1295_p12, %p258_p13  ;;  %s164_s11 = ssub.s32 %s1639_s28, %s2415_s8 }
  0x21   : > { %s167_s12 = sadd.s32 1, %s1623_s0  ;;  %p165_p2 = scmp.eq.s32.totalorder %s164_s11, 0  ;;  %v361_v0 = vlaneseq (!%p259_p1) }
  0x22   : > { %262 = sbr.rel (%p259_p1) target bundleno = 1035 (0x40b), region = 36  ;;  %p314_p3 = scmp.lt.s32.totalorder (!%p259_p1), %s1631_s26, 1 }
  0x23   : > { %s1750_s13 = scalar_select %p165_p2, %s1623_s0, %s167_s12  }
  0x24   : > { %v1755_v1 = vshrl.u32 (!%p259_p1), %v361_v0, 7  ;;  %v1757_v2 = vand.u32 (!%p259_p1), 127, %v361_v0  ;;  %s325_s16 = sld [smem:[#allocation8 + %s1631_s26]] (!%p259_p1)  ;;  %s1777_s11 = sadd.s32 (!%p259_p1), 1, %s1627_s25 }
  0x25   : > { %2383 = sst [smem:[#allocation18_spill]] %s1750_s13  ;;  %s2384_s1 = sld [smem:[#allocation19_spill]] (!%p259_p1) }
  0x26   : > { %s342_s17 = sld [smem:[#allocation8 + %s1631_s26]] (!%p259_p1)  ;;  %v1762_v3 = vadd.s32 (!%p259_p1), 8, %v1755_v1  ;;  %vm366_vm0 = vcmp.eq.s32.totalorder (!%p259_p1), %v1755_v1, %v1757_v2  ;;  %p1306_p9 = scmp.ne.s32.totalorder (!%p259_p1), %s1627_s25, 0 }
  0x27   : > { %s2385_s2 = sld [smem:[#allocation20_spill]] (!%p259_p1) }
  0x28   : > { %s1780_s12 = sld [smem:[#allocation8 + %s1631_s26]] (!%p259_p1)  ;;  %vm367_vm1 = vcmp.eq.s32.totalorder (!%p259_p1), %v1762_v3, %v1757_v2 }
  0x29   : > { %s315_s15 = scalar_select %p314_p3, %s1631_s26, 1 }
  0x2a   : > { %p326_p4 = scmp.lt.s32.totalorder %s1777_s11, %s325_s16  ;;  %vm372_vm2 = vcmask (!%p1306_p9), 130048   ;;  %v383_v4 = vadd.s32 (!%p1306_p9), 1, %v1755_v1  ;;  %v384_v5 = vadd.s32 (!%p1306_p9), 1, %v1762_v3  ;;  %v1646_v6 = vmov (!%p1306_p9), -1e+09  }
  0x2b   : > { %s1322_s18 = sshll.u32 %s315_s15, 4  ;;  %s1301_s22 = sshll.u32 %s315_s15, 5  ;;  %373 = vst.msk [vmem:[#allocation2] sm:$0xff] (!%p1306_p9), %vm372_vm2, %v1646_v6  ;;  %374 = vst.msk [vmem:[#allocation2 + $0x8] sm:$0xff] (!%p1306_p9), %vm372_vm2, %v1646_v6  ;;  %v377_v7 = vsel (!%p1306_p9), %vm366_vm0, 0.0, %v1646_v6  ;;  %v378_v8 = vsel (!%p1306_p9), %vm367_vm1, 0.0, %v1646_v6 }
  0x2c   : > { %s1769_s21 = scalar_lea.vmem %s2384_s1, %s1322_s18  ;;  %p343_p5 = scmp.lt.s32.totalorder %s1777_s11, %s342_s17  ;;  %375 = vst.msk [vmem:[#allocation3] sm:$0xff] (!%p1306_p9), %vm372_vm2, %v1646_v6  ;;  %376 = vst.msk [vmem:[#allocation3 + $0x8] sm:$0xff] (!%p1306_p9), %vm372_vm2, %v1646_v6  ;;  %vm385_vm3 = vcmp.eq.s32.totalorder (!%p1306_p9), %v1757_v2, %v383_v4  ;;  %vm386_vm4 = vcmp.eq.s32.totalorder (!%p1306_p9), %v1757_v2, %v384_v5 }
  0x2d   : > { %s1774_s6 = scalar_lea.vmem %s2385_s2, %s1322_s18  ;;  %s2386_s15 = sand.u32 1, %s1619_s24   ;;  %379 = vst.msk [vmem:[#allocation4] sm:$0xff] (!%p1306_p9), %vm372_vm2, %v377_v7  ;;  %381 = vst.msk [vmem:[#allocation5] sm:$0xff] (!%p1306_p9), %vm372_vm2, %v377_v7  ;;  %v387_v9 = vsel (!%p1306_p9), %vm385_vm3, 0.0, %v1646_v6  ;;  %v388_v10 = vsel (!%p1306_p9), %vm386_vm4, 0.0, %v1646_v6 }
  0x2e   : > { %s327_s19 = scalar_select %p326_p4, %s1777_s11, %s325_s16 }
  0x2f   : > { %s344_s20 = scalar_select %p343_p5, %s1777_s11, %s342_s17 }
  0x30   : > { %p330_p6 = scmp.lt.s32.totalorder %s327_s19, 15  ;;  %s1800_s17 = scalar_lea.vmem [#allocation9], %s2386_s15  ;;  %380 = vst.msk [vmem:[#allocation4 + $0x8] sm:$0xff] (!%p1306_p9), %vm372_vm2, %v378_v8  ;;  %382 = vst.msk [vmem:[#allocation5 + $0x8] sm:$0xff] (!%p1306_p9), %vm372_vm2, %v378_v8 }
  0x31   : > { %p347_p7 = scmp.lt.s32.totalorder %s344_s20, 15  ;;  %371 = sbr.rel (%p1306_p9) target bundleno = 56 (0x38), region = 40  ;;  %389 = vst.msk [vmem:[#allocation6] sm:$0xff] (!%p1306_p9), %vm372_vm2, %v387_v9  ;;  %390 = vst.msk [vmem:[#allocation6 + $0x8] sm:$0xff] (!%p1306_p9), %vm372_vm2, %v388_v10 }
  0x32   : > { %s2417_s19 = smov (!%p330_p6, %s327_s19), 15 }
  0x33   : > { %s2419_s20 = smov (!%p347_p7, %s344_s20), 15  ;;  %s1300_s18 = sshll.u32 %s2417_s19, 1 }
  0x34   : > { %s334_s30 = sadd.s32 %s1301_s22, %s1300_s18  ;;  %s1303_s14 = sshll.u32 %s2419_s20, 1 }
  0x35   : > { %s1302_s1 = sshll.u32 %s334_s30, 3  ;;  %s351_s2 = sadd.s32 %s1303_s14, %s1301_s22 }
  0x36   : > { %s1791_s28 = scalar_lea.vmem %s2363_s3, %s1302_s1  ;;  %s1305_s27 = sshll.u32 %s351_s2, 3 }
  0x37   : > { %s1796_s16 = scalar_lea.vmem %s2364_s4, %s1305_s27 }
  0x38 PF: > { %p1307_p10 = scmp.gt.s32.totalorder %s1777_s11, %s1780_s12 }
  0x39   : > { %v1825_v11 = vld [vmem:[#allocation2] sm:$0xff] (!%p1307_p10)  ;;  %v1827_v12 = vld [vmem:[#allocation2 + $0x8] sm:$0xff] (!%p1307_p10)  ;;  %v1829_v13 = vld [vmem:[#allocation3] sm:$0xff] (!%p1307_p10)  ;;  %v1832_v14 = vstv (!%p1307_p10), %s1777_s11  ;;  %v1647_v15 = vmov (!%p1307_p10), 0.0   ;;  %vm1648_vm5 = vmmov (!%p1307_p10), 0   ;;  %vm464_vm8 = vcmask (!%p1307_p10), 130048   ;;  %p1049_p11 = scmp.ne.s32.totalorder (!%p1307_p10), %s1777_s11, %s1780_s12 }
  0x3a   : > { %394 = sbr.rel (%p1307_p10) target bundleno = 1001 (0x3e9), region = 44  ;;  %1340 = vmatprep.subr.bf16.mxu0 (!%p1307_p10), %v1647_v15  ;;  %1352 = vmatprep.subr.bf16.mxu1 (!%p1307_p10), %v1647_v15  ;;  %v435_v16 = vpack.c.bf16 (!%p1307_p10), %v1827_v12, %v1825_v11  ;;  %v1838_v17 = vld [vmem:[#allocation3 + $0x8] sm:$0xff] (!%p1307_p10)  ;;  %v1842_v18 = vadd.s32 (!%p1307_p10), %v1832_v14, %v1755_v1  ;;  %v1846_v19 = vadd.s32 (!%p1307_p10), %v1832_v14, %v1762_v3  ;;  %v1876_v33 = vld [vmem:[#allocation4] sm:$0xff] (!%p1307_p10)  ;;  %v1878_v34 = vld [vmem:[#allocation4 + $0x8] sm:$0xff] (!%p1307_p10)  ;;  %vm907_vm14 = vcmp.gt.s32.totalorder (!%p1307_p10), %v1755_v1, 0 }
  0x3b   : > { %v441_v20 = vpack.c.bf16 (!%p1307_p10), %v1838_v17, %v1829_v13  ;;  %1342 = vmatprep.mubr.msk.bf16.mxu0 (!%p1307_p10), %vm1648_vm5, %v1647_v15  ;;  %1354 = vmatprep.mubr.msk.bf16.mxu1 (!%p1307_p10), %vm1648_vm5, %v1647_v15  ;;  %v447_v38 = vpack.c.bf16 (!%p1307_p10), %v1878_v34, %v1876_v33  ;;  %v1905_v44 = vld [vmem:[#allocation5] sm:$0xff] (!%p1307_p10)  ;;  %v1907_v45 = vld [vmem:[#allocation5 + $0x8] sm:$0xff] (!%p1307_p10)  ;;  %vm405_vm9 = vcmp.gt.s32.totalorder (!%p1307_p10), %v1757_v2, %v1755_v1  ;;  %v818_v61 = vld [vmem:[%s1796_s16] sm:$0xff] (!%p1307_p10) }
  0x3c   : > { %v436_v21 = vunpack.c.l.bf16 (!%p1307_p10), %v435_v16  ;;  %v437_v22 = vunpack.c.h.bf16 (!%p1307_p10), %v435_v16  ;;  %vm1856_vm6 = vcmp.eq.s32.totalorder (!%p1307_p10), %v1757_v2, %v1842_v18  ;;  %vm1862_vm7 = vcmp.eq.s32.totalorder (!%p1307_p10), %v1757_v2, %v1846_v19  ;;  %v816_v5 = vld [vmem:[%s1791_s28] sm:$0xff] (!%p1307_p10) }
  0x3d   : > { %v442_v25 = vunpack.c.l.bf16 (!%p1307_p10), %v441_v20  ;;  %v443_v26 = vunpack.c.h.bf16 (!%p1307_p10), %v441_v20  ;;  %v1308_v29 = vsel (!%p1307_p10), %vm1856_vm6, 1.0, %v1647_v15  ;;  %v1309_v30 = vsel (!%p1307_p10), %vm1862_vm7, 1.0, %v1647_v15 }
  0x3e   : > { %v438_v27 = vsub.f32 (!%p1307_p10), %v1825_v11, %v436_v21  ;;  %v439_v28 = vsub.f32 (!%p1307_p10), %v1827_v12, %v437_v22  ;;  %v463_v37 = vpack.c.bf16 (!%p1307_p10), %v1309_v30, %v1308_v29  ;;  %v448_v39 = vunpack.c.l.bf16 (!%p1307_p10), %v447_v38 }
  0x3f   : > { %v444_v31 = vsub.f32 (!%p1307_p10), %v1829_v13, %v442_v25  ;;  %v445_v32 = vsub.f32 (!%p1307_p10), %v1838_v17, %v443_v26  ;;  %v449_v40 = vunpack.c.h.bf16 (!%p1307_p10), %v447_v38  ;;  %v453_v46 = vpack.c.bf16 (!%p1307_p10), %v1907_v45, %v1905_v44 }
  0x40   : > { %v440_v35 = vpack.c.bf16 (!%p1307_p10), %v439_v28, %v438_v27  ;;  %v450_v41 = vsub.f32 (!%p1307_p10), %v1876_v33, %v448_v39  ;;  %vm407_vm10 = vcmp.lt.s32.totalorder (!%p1307_p10), %v1757_v2, %v1842_v18  ;;  %vm2373_vm11 = vcmp.lt.s32.totalorder (!%p1307_p10), %v1842_v18, 16 }
  0x41   : > { %v446_v36 = vpack.c.bf16 %v445_v32, %v444_v31  ;;  %v451_v42 = vsub.f32 %v1878_v34, %v449_v40  ;;  %v454_v47 = vunpack.c.l.bf16 %v453_v46  ;;  %v455_v48 = vunpack.c.h.bf16 %v453_v46  ;;  %vm409_vm12 = vmand %vm405_vm9, %vm407_vm10  ;;  %s1050_s1 = scalar_select %p1049_p11, 1, 0 }
  0x42   : > { %1341 = vmatpush3.bf16.msra.mxu0 %v440_v35  ;;  %vm1931_vm13 = vmand %vm409_vm12, %vm2373_vm11  ;;  %vm406_vm15 = vcmp.gt.s32.totalorder %v1757_v2, %v1762_v3  ;;  %vm408_vm2 = vcmp.lt.s32.totalorder %v1757_v2, %v1846_v19  ;;  %vm404_vm4 = vcmp.lt.s32.totalorder %v1846_v19, 16 }
  0x43   : > { %1353 = vmatpush3.bf16.msra.mxu1 %v446_v36  ;;  %1346 = vmatprep.subr.bf16.mxu0 %v1647_v15  ;;  %v452_v43 = vpack.c.bf16 %v451_v42, %v450_v41  ;;  %v456_v49 = vsub.f32 %v1905_v44, %v454_v47  ;;  %v457_v50 = vsub.f32 %v1907_v45, %v455_v48  ;;  %vm909_vm3 = vmand %vm1931_vm13, %vm907_vm14 }
  0x44   : > { %1358 = vmatprep.subr.bf16.mxu1 %v1647_v15 }
  0x45   : > { %1343 = vmatmul.mubr.msk.bf16.vlgmr.msra.gmra.mrb[0].mxu0 %vm464_vm8, %v463_v37  ;;  %v458_v51 = vpack.c.bf16 %v457_v50, %v456_v49 }
  0x46   : > { %1355 = vmatmul.mubr.msk.bf16.vlgmr.msra.gmra.mrb[0].mxu1 %vm464_vm8, %v463_v37  ;;  %1347 = vmatpush3.bf16.msra.mxu0 %v435_v16  ;;  %v819_v16 = vld [vmem:[%s1796_s16 + $0x8] sm:$0xff] }
  0x47   : > { %1359 = vmatpush3.bf16.msra.mxu1 %v441_v20  ;;  %1360 = vmatprep.mubr.msk.bf16.mxu1 %vm1648_vm5, %v1647_v15 }
  0x48   : > { %1348 = vmatprep.mubr.msk.bf16.mxu0 %vm1648_vm5, %v1647_v15  ;;  %1364 = vmatprep.subr.bf16.mxu0 %v1647_v15 }
  0x49   : > { %1376 = vmatprep.subr.bf16.mxu1 %v1647_v15 }
  0x4e   : > { %1361 = vmatmul.mubr.msk.bf16.vlgmr.msra.gmra.mrb[4].mxu1 %vm464_vm8, %v463_v37 }
  0x4f   : > { %1378 = vmatprep.mubr.msk.bf16.mxu1 %vm1648_vm5, %v1647_v15  ;;  %1377 = vmatpush3.bf16.msra.mxu1 %v458_v51 }
  0x50   : > { %1382 = vmatprep.subr.bf16.mxu1 %v1647_v15 }
  0x51   : > { %1349 = vmatmul.mubr.msk.bf16.vlgmr.msra.gmra.mrb[0].mxu0 %vm464_vm8, %v463_v37 }
  0x52   : > { %1365 = vmatpush3.bf16.msra.mxu0 %v452_v43  ;;  %1366 = vmatprep.mubr.msk.bf16.mxu0 %vm1648_vm5, %v1647_v15 }
  0x53   : > { %1370 = vmatprep.subr.bf16.mxu0 %v1647_v15 }
  0x56   : > { %1379 = vmatmul.mubr.msk.bf16.vlgmr.msra.gmra.mrb[8].mxu1 %vm464_vm8, %v463_v37 }
  0x57   : > { %1383 = vmatpush3.bf16.msra.mxu1 %v453_v46  ;;  %1384 = vmatprep.mubr.msk.bf16.mxu1 %vm1648_vm5, %v1647_v15 }
  0x59   : > { %1367 = vmatmul.mubr.msk.bf16.vlgmr.msra.gmra.mrb[4].mxu0 %vm464_vm8, %v463_v37 }
  0x5a   : > { %1371 = vmatpush3.bf16.msra.mxu0 %v447_v38  ;;  %1372 = vmatprep.mubr.msk.bf16.mxu0 %vm1648_vm5, %v1647_v15  ;;  %v817_v15 = vld [vmem:[%s1791_s28 + $0x8] sm:$0xff]  ;;  %vm410_vm5 = vmand %vm406_vm15, %vm408_vm2 }
  0x5b   : > { %vm412_vm12 = vmand %vm410_vm5, %vm404_vm4 }
  0x5e   : > { %1385 = vmatmul.mubr.msk.bf16.vlgmr.msra.gmra.mrb[12].mxu1 %vm464_vm8, %v463_v37 }
  0x65   : > { %1373 = vmatmul.mubr.msk.bf16.vlgmr.msra.gmra.mrb[4].mxu0 %vm464_vm8, %v463_v37 }
 0x119   : > { %v584_v52 = vpop.f32.mrb[0].mxu1 }
 0x11a   : > { %v1356_v53 = vpop.f32.mrb[1].mxu1 }
 0x11b   : > { %v587_v54 = vpop.f32.mrb[2].mxu1 }
 0x11c   : > { %v1357_v55 = vpop.f32.mrb[3].mxu1 }
 0x121   : > { %v625_v56 = vpop.f32.mrb[4].mxu1 }
 0x122   : > { %v626_v57 = vadd.f32 %v625_v56, %v584_v52  ;;  %v1362_v58 = vpop.f32.mrb[5].mxu1 }
 0x123   : > { %v628_v60 = vpop.f32.mrb[6].mxu1 }
 0x124   : > { %v891_v62 = vadd.f32 %v626_v57, %v1825_v11  ;;  %v629_v63 = vadd.f32 %v628_v60, %v587_v54  ;;  %v1363_v0 = vpop.f32.mrb[7].mxu1  ;;  %v1938_v4 = vpop.f32.mrb[0].mxu0  ;;  %v1986_v54 = vstv %s1627_s25 }
 0x125   : > { %v820_v6 = vadd.f32 %v1938_v4, %v1829_v13  ;;  %v1350_v7 = vpop.f32.mrb[1].mxu0  ;;  %v827_v56 = vadd.s32 %v1986_v54, %v1755_v1  ;;  %v828_v59 = vadd.s32 %v1986_v54, %v1762_v3 }
 0x126   : > { %v892_v8 = vadd.f32 %v629_v63, %v1827_v12  ;;  %v1950_v9 = vpop.f32.mrb[2].mxu0  ;;  %v893_v10 = vadd.f32 %v891_v62, %v818_v61  ;;  %v1995_v61 = vadd.s32 1, %v1755_v1 }
 0x127   : > { %v821_v20 = vadd.f32 %v1950_v9, %v1838_v17  ;;  %v1351_v21 = vpop.f32.mrb[3].mxu0  ;;  %v822_v22 = vadd.f32 %v820_v6, %v816_v5  ;;  %vm830_vm14 = vcmp.eq.s32.totalorder %v1757_v2, %v828_v59 }
 0x128   : > { %v911_v25 = vsel %vm909_vm3, %v893_v10, -1e+09  ;;  %v894_v28 = vadd.f32 %v892_v8, %v819_v16  ;;  %vm2370_vm3 = vcmp.eq.s32.totalorder %v1757_v2, %v1995_v61  ;;  %v2005_v8 = vadd.s32 1, %v1762_v3  ;;  %v798_v16 = vld [vmem:[%s1774_s6] sm:$0xff] }
 0x129   : > { %v913_v26 = vsel %vm464_vm8, %v911_v25, -inf  ;;  %v823_v27 = vadd.f32 %v821_v20, %v817_v15  ;;  %v841_v29 = vsel %vm1931_vm13, %v822_v22, -1e+09  ;;  %vm829_vm13 = vcmp.eq.s32.totalorder %v1757_v2, %v827_v56 }
 0x12a   : > { %914 = vmax.xlane.f32.xlu0 %v913_v26  ;;  %v843_v32 = vsel %vm464_vm8, %v841_v29, -inf  ;;  %v912_v35 = vsel %vm412_vm12, %v894_v28, -1e+09  ;;  %v831_v0 = vsel %vm829_vm13, %v1876_v33, 0.0  ;;  %v832_v15 = vsel %vm830_vm14, %v1878_v34, 0.0  ;;  %v797_v26 = vld [vmem:[%s1769_s21 + $0x8] sm:$0xff] }
 0x12b   : > { %v842_v30 = vsel %vm412_vm12, %v823_v27, -1e+09  ;;  %v916_v36 = vsel %vm464_vm8, %v912_v35, -inf  ;;  %v833_v7 = vsel %vm464_vm8, %v831_v0, 0.0  ;;  %v836_v21 = vsel %vm464_vm8, %v832_v15, 0.0  ;;  %v796_v27 = vld [vmem:[%s1769_s21] sm:$0xff] }
 0x12c   : > { %v846_v31 = vsel %vm464_vm8, %v842_v30, -inf  ;;  %vm2371_vm5 = vcmp.eq.s32.totalorder %v1757_v2, %v2005_v8  ;;  %v808_v22 = vsel %vm1856_vm6, %v798_v16, 0.0  ;;  %vm420_vm12 = vcmp.le.s32.totalorder %v1757_v2, %v1846_v19 }
 0x12d   : > { %847 = vmax.xlane.f32.xlu1 %v846_v31  ;;  %v801_v31 = vsel %vm1862_vm7, %v797_v26, 0.0  ;;  %vm422_vm13 = vmand %vm406_vm15, %vm420_vm12  ;;  %vm419_vm14 = vcmp.le.s32.totalorder %v1757_v2, %v1842_v18 }
 0x12e   : > { %844 = vmax.xlane.f32.xlu0 %v843_v32  ;;  %v800_v32 = vsel %vm1856_vm6, %v796_v27, 0.0  ;;  %vm421_vm15 = vmand %vm405_vm9, %vm419_vm14  ;;  %vm2372_vm9 = vcmp.eq.s32.totalorder %v1755_v1, 0  ;;  %vm413_vm14 = vcmp.ge.s32.totalorder %v1757_v2, %v1755_v1 }
 0x12f   : > { %vm2066_vm12 = vmand %vm421_vm15, %vm2373_vm11  ;;  %vm1057_vm15 = vcmp.eq.s32.totalorder %v1757_v2, %v1755_v1 }
 0x130   : > { %vm415_vm11 = vmand %vm413_vm14, %vm407_vm10 }
 0x131   : > { %917 = vmax.xlane.f32.xlu1 %v916_v36  ;;  %v799_v36 = vld [vmem:[%s1774_s6 + $0x8] sm:$0xff] }
 0x138   : > { %v1971_v37 = vpop.f32.mrb[4].mxu0 }
 0x139   : > { %v1374_v38 = vpop.f32.mrb[5].mxu0  ;;  %v899_v20 = vsel %vm2370_vm3, %v1971_v37, 0.0  ;;  %vm2048_vm3 = vmand %vm422_vm13, %vm404_vm4  ;;  %vm414_vm13 = vcmp.ge.s32.totalorder %v1757_v2, %v1762_v3 }
 0x13a   : > { %v710_v39 = vpop.f32.mrb[6].mxu0 }
 0x13b   : > { %v1375_v40 = vpop.f32.mrb[7].mxu0  ;;  %v900_v28 = vsel %vm2371_vm5, %v710_v39, 0.0  ;;  %vm416_vm5 = vmand %vm414_vm13, %vm408_vm2  ;;  %vm2400_vm13 = vcmp.eq.s32.totalorder %v1757_v2, %v1995_v61 }
 0x13c   : > { %v2042_v40 = vld [vmem:[#allocation6] sm:$0xff]  ;;  %vm418_vm2 = vmand %vm416_vm5, %vm404_vm4 }
 0x1b7   : > { %v1973_v41 = vpop.xlane.xlu0 %914 }
 0x1b8   : > { %v919_v42 = vsub.f32 %v911_v25, %v1973_v41  ;;  %v901_v25 = vsel %vm464_vm8, %v899_v20, 0.0 }
 0x1ba   : > { %v921_v43 = vmul.f32 1.442695, %v919_v42  ;;  %v1976_v46 = vpop.xlane.xlu1 %847  ;;  %v805_v42 = vsel %vm464_vm8, %v801_v31, 0.0 }
 0x1bb   : > { %v1978_v47 = vpop.xlane.xlu0 %844  ;;  %v850_v48 = vsub.f32 %v842_v30, %v1976_v46  ;;  %v810_v30 = vsel %vm464_vm8, %v808_v22, 0.0 }
 0x1bc   : > { %1471 = vpow2.f32 %v921_v43  ;;  %v849_v49 = vsub.f32 %v841_v29, %v1978_v47  ;;  %v2027_v29 = vld [vmem:[#allocation6 + $0x8] sm:$0xff]  ;;  %v802_v43 = vsel %vm464_vm8, %v800_v32, 0.0 }
 0x1bd   : > { %v853_v50 = vmul.f32 1.442695, %v850_v48  ;;  %v962_v38 = vadd.f32 %v710_v39, %v2027_v29  ;;  %v961_v39 = vadd.f32 %v1971_v37, %v2042_v40 }
 0x1be   : > { %v851_v51 = vmul.f32 1.442695, %v849_v49  ;;  %v1982_v52 = vpop.xlane.xlu1 %917  ;;  %v809_v49 = vsel %vm1862_vm7, %v799_v36, 0.0 }
 0x1bf   : > { %1473 = vpow2.f32 %v853_v50  ;;  %v920_v53 = vsub.f32 %v912_v35, %v1982_v52  ;;  %v904_v35 = vsel %vm464_vm8, %v900_v28, 0.0  ;;  %v2061_v50 = vsel %vm2048_vm3, %v962_v38, -1e+09 }
 0x1c0   : > { %1475 = vpow2.f32 %v851_v51  ;;  %v813_v51 = vsel %vm464_vm8, %v809_v49, 0.0  ;;  %v2074_v37 = vsel %vm2066_vm12, %v961_v39, -1e+09 }
 0x1c1   : > { %v923_v55 = vmul.f32 1.442695, %v920_v53  ;;  %v965_v56 = vsel %vm464_vm8, %v2074_v37, -inf }
 0x1c3   : > { %1477 = vpow2.f32 %v923_v55  ;;  %v968_v55 = vsel %vm464_vm8, %v2061_v50, -inf }
 0x1c6   : > { %v1472_v57 = vpop.eup %1471 }
 0x1c7   : > { %v925_v58 = vsel %vm464_vm8, %v1472_v57, 0.0  ;;  %v748_v57 = vpop.f32.mrb[8].mxu1 }
 0x1c8   : > { %926 = vadd.xlane.f32.xlu0 %v925_v58  ;;  %v1380_v58 = vpop.f32.mrb[9].mxu1 }
 0x1c9   : > { %v1474_v60 = vpop.eup %1473  ;;  %v751_v59 = vpop.f32.mrb[10].mxu1 }
 0x1ca   : > { %v1476_v62 = vpop.eup %1475  ;;  %v858_v63 = vsel %vm464_vm8, %v1474_v60, 0.0  ;;  %v1381_v60 = vpop.f32.mrb[11].mxu1 }
 0x1cb   : > { %v855_v5 = vsel %vm464_vm8, %v1476_v62, 0.0  ;;  %v789_v62 = vpop.f32.mrb[12].mxu1 }
 0x1cc   : > { %856 = vadd.xlane.f32.xlu1 %v855_v5  ;;  %859 = vadd.xlane.f32.xlu0 %v858_v63  ;;  %v1386_v63 = vpop.f32.mrb[13].mxu1  ;;  %v2078_v5 = vadd.f32 %v789_v62, %v748_v57 }
 0x1cd   : > { %v1478_v6 = vpop.eup %1477  ;;  %v792_v0 = vpop.f32.mrb[14].mxu1 }
 0x1ce   : > { %v928_v10 = vsel %vm464_vm8, %v1478_v6, 0.0  ;;  %v2080_v6 = vadd.f32 %v792_v0, %v751_v59 }
 0x1d0   : > { %834 = vadd.xlane.f32.xlu0 %v833_v7  ;;  %929 = vadd.xlane.f32.xlu1 %v928_v10  ;;  %v1387_v7 = vpop.f32.mrb[15].mxu1 }
 0x1d4   : > { %837 = vadd.xlane.f32.xlu0 %v836_v21  ;;  %902 = vadd.xlane.f32.xlu1 %v901_v25 }
 0x1d8   : > { %811 = vadd.xlane.f32.xlu0 %v810_v30  ;;  %905 = vadd.xlane.f32.xlu1 %v904_v35 }
 0x1dc   : > { %806 = vadd.xlane.f32.xlu0 %v805_v42  ;;  %803 = vadd.xlane.f32.xlu1 %v802_v43 }
 0x1e0   : > { %969 = vmax.xlane.f32.xlu0 %v968_v55  ;;  %814 = vadd.xlane.f32.xlu1 %v813_v51 }
 0x1e4   : > { %966 = vmax.xlane.f32.xlu1 %v965_v56 }
 0x255   : > { %v927_v10 = vpop.xlane.xlu0 %926 }
 0x256   : > { %1479 = vlog2.f32 %v927_v10 }
 0x259   : > { %v860_v15 = vpop.xlane.xlu0 %859  ;;  %v857_v16 = vpop.xlane.xlu1 %856 }
 0x25a   : > { %1481 = vlog2.f32 %v860_v15 }
 0x25b   : > { %1483 = vlog2.f32 %v857_v16 }
 0x25d   : > { %v930_v20 = vpop.xlane.xlu1 %929  ;;  %v835_v25 = vpop.xlane.xlu0 %834 }
 0x25e   : > { %1485 = vlog2.f32 %v930_v20  ;;  %v839_v36 = vsel %vm2372_vm9, 0.0, %v835_v25  ;;  %vm1058_vm9 = vcmp.eq.s32.totalorder %v1757_v2, %v1762_v3 }
 0x260   : > { %v1480_v21 = vpop.eup %1479 }
 0x261   : > { %v932_v22 = vmul.f32 0.6931472, %v1480_v21  ;;  %v903_v28 = vpop.xlane.xlu1 %902  ;;  %v838_v51 = vpop.xlane.xlu0 %837 }
 0x263   : > { %v935_v26 = vadd.f32 %v932_v22, %v1973_v41 }
 0x264   : > { %v1482_v27 = vpop.eup %1481 }
 0x265   : > { %v1484_v30 = vpop.eup %1483  ;;  %v864_v31 = vmul.f32 0.6931472, %v1482_v27  ;;  %v937_v32 = vmax.f32 %v935_v26, %v903_v28  ;;  %v906_v0 = vpop.xlane.xlu1 %905 }
 0x266   : > { %v862_v35 = vmul.f32 0.6931472, %v1484_v30 }
 0x267   : > { %v866_v38 = vadd.f32 %v864_v31, %v1976_v46  ;;  %v939_v42 = vsub.f32 %v935_v26, %v937_v32  ;;  %v945_v43 = vsub.f32 %v903_v28, %v937_v32 }
 0x268   : > { %v1486_v49 = vpop.eup %1485  ;;  %v865_v39 = vadd.f32 %v862_v35, %v1978_v47 }
 0x269   : > { %v934_v41 = vmul.f32 0.6931472, %v1486_v49  ;;  %v2088_v55 = vmax.f32 %v866_v38, %v838_v51  ;;  %v941_v56 = vmul.f32 1.442695, %v939_v42  ;;  %v947_v57 = vmul.f32 1.442695, %v945_v43  ;;  %v804_v30 = vpop.xlane.xlu1 %803 }
 0x26a   : > { %v867_v58 = vmax.f32 %v865_v39, %v839_v36 }
 0x26b   : > { %v870_v59 = vsub.f32 %v866_v38, %v2088_v55  ;;  %v876_v60 = vsub.f32 %v838_v51, %v2088_v55  ;;  %1487 = vpow2.f32 %v941_v56  ;;  %v936_v62 = vadd.f32 %v934_v41, %v1982_v52  ;;  %v812_v52 = vpop.xlane.xlu0 %811 }
 0x26c   : > { %v869_v46 = vsub.f32 %v865_v39, %v867_v58  ;;  %v875_v63 = vsub.f32 %v839_v36, %v867_v58  ;;  %1489 = vpow2.f32 %v947_v57 }
 0x26d   : > { %v873_v7 = vmul.f32 1.442695, %v870_v59  ;;  %v2093_v47 = vmax.f32 %v936_v62, %v906_v0  ;;  %v879_v16 = vmul.f32 1.442695, %v876_v60  ;;  %v815_v41 = vpop.xlane.xlu1 %814 }
 0x26e   : > { %v871_v10 = vmul.f32 1.442695, %v869_v46  ;;  %v877_v15 = vmul.f32 1.442695, %v875_v63 }
 0x26f   : > { %1491 = vpow2.f32 %v873_v7  ;;  %v940_v20 = vsub.f32 %v936_v62, %v2093_v47  ;;  %v946_v21 = vsub.f32 %v906_v0, %v2093_v47  ;;  %v807_v36 = vpop.xlane.xlu0 %806 }
 0x270   : > { %1493 = vpow2.f32 %v871_v10 }
 0x271   : > { %1495 = vpow2.f32 %v877_v15  ;;  %v943_v22 = vmul.f32 1.442695, %v940_v20  ;;  %v949_v25 = vmul.f32 1.442695, %v946_v21  ;;  %v2101_v46 = vpop.xlane.xlu1 %966 }
 0x272   : > { %1497 = vpow2.f32 %v879_v16  ;;  %v971_v7 = vsub.f32 %v2074_v37, %v2101_v46 }
 0x273   : > { %1499 = vpow2.f32 %v943_v22  ;;  %v2097_v57 = vpop.xlane.xlu0 %969 }
 0x274   : > { %1501 = vpow2.f32 %v949_v25  ;;  %v972_v60 = vsub.f32 %v2061_v50, %v2097_v57  ;;  %v973_v37 = vmul.f32 1.442695, %v971_v7 }
 0x275   : > { %v1488_v26 = vpop.eup %1487 }
 0x276   : > { %v1490_v27 = vpop.eup %1489  ;;  %v975_v0 = vmul.f32 1.442695, %v972_v60 }
 0x277   : > { %v951_v28 = vadd.f32 %v1490_v27, %v1488_v26 }
 0x279   : > { %v1492_v31 = vpop.eup %1491  ;;  %1503 = vlog2.f32 %v951_v28 }
 0x27a   : > { %v1494_v35 = vpop.eup %1493 }
 0x27b   : > { %v1496_v38 = vpop.eup %1495 }
 0x27c   : > { %v1498_v42 = vpop.eup %1497  ;;  %v881_v43 = vadd.f32 %v1496_v38, %v1494_v35 }
 0x27d   : > { %v1500_v49 = vpop.eup %1499  ;;  %v882_v39 = vadd.f32 %v1498_v42, %v1492_v31 }
 0x27e   : > { %v1502_v51 = vpop.eup %1501  ;;  %1505 = vlog2.f32 %v881_v43 }
 0x27f   : > { %1507 = vlog2.f32 %v882_v39  ;;  %v952_v56 = vadd.f32 %v1502_v51, %v1500_v49 }
 0x281   : > { %1509 = vlog2.f32 %v952_v56 }
 0x282   : > { %1511 = vpow2.f32 %v975_v0 }
 0x283   : > { %v1504_v59 = vpop.eup %1503  ;;  %1513 = vpow2.f32 %v973_v37 }
 0x284   : > { %v954_v62 = vmul.f32 0.6931472, %v1504_v59 }
 0x286   : > { %v957_v63 = vadd.f32 %v954_v62, %v937_v32 }
 0x288   : > { %v1506_v10 = vpop.eup %1505  ;;  %v2105_v15 = vadd.f32 %v957_v63, %v812_v52 }
 0x289   : > { %v1508_v16 = vpop.eup %1507  ;;  %v884_v20 = vmul.f32 0.6931472, %v1506_v10 }
 0x28a   : > { %v886_v21 = vmul.f32 0.6931472, %v1508_v16  ;;  %v1019_v50 = vsel %vm1856_vm6, %v2105_v15, %v1825_v11  ;;  %v2165_v16 = vadd.s32 %v1832_v14, %v1757_v2 }
 0x28b   : > { %v1510_v32 = vpop.eup %1509  ;;  %v887_v22 = vadd.f32 %v884_v20, %v867_v58  ;;  %v1021_v25 = vadd.f32 %v1019_v50, %v2078_v5 }
 0x28c   : > { %v888_v52 = vadd.f32 %v886_v21, %v2088_v55  ;;  %v956_v26 = vmul.f32 0.6931472, %v1510_v32  ;;  %v1512_v60 = vpop.eup %1511 }
 0x28d   : > { %v889_v27 = vadd.f32 %v887_v22, %v804_v30  ;;  %v1023_v58 = vsel %vm2066_vm12, %v1021_v25, -1e+09  ;;  %v980_v10 = vsel %vm464_vm8, %v1512_v60, 0.0  ;;  %vm2399_vm12 = vcmp.eq.s32.totalorder %v1757_v2, %v2005_v8 }
 0x28e   : > { %v890_v5 = vadd.f32 %v888_v52, %v807_v36  ;;  %v958_v55 = vadd.f32 %v956_v26, %v2093_v47  ;;  %v1025_v28 = vsel %vm464_vm8, %v1023_v58, -inf }
 0x28f   : > { %v989_v31 = vsel %vm366_vm0, %v889_v27, %v1938_v4  ;;  %v1059_v30 = vsel %vm1057_vm15, %v889_v27, 0.0  ;;  %1026 = vmax.xlane.f32.xlu0 %v1025_v28  ;;  %vm2397_vm0 = vcmp.lt.s32.totalorder %v1842_v18, 16 }
 0x290   : > { %v990_v53 = vsel %vm367_vm1, %v890_v5, %v1950_v9  ;;  %v1060_v47 = vsel %vm1058_vm9, %v890_v5, 0.0  ;;  %v1061_v4 = vsel %vm464_vm8, %v1059_v30, 0.0  ;;  %v960_v35 = vadd.f32 %v958_v55, %v815_v41  ;;  %vm417_vm10 = vmand %vm415_vm11, %vm2397_vm0 }
 0x291   : > { %v1062_v36 = vsel %vm464_vm8, %v1060_v47, 0.0  ;;  %v992_v38 = vadd.f32 %v990_v53, %v1907_v45  ;;  %v991_v42 = vadd.f32 %v989_v31, %v1905_v44  ;;  %vm401_vm1 = vcmp.eq.s32.totalorder %v1755_v1, %v2165_v16 }
 0x292   : > { %v1063_v43 = vadd.f32 %v1062_v36, %v1061_v4  ;;  %v1020_v9 = vsel %vm1862_vm7, %v960_v35, %v1827_v12  ;;  %vm402_vm11 = vcmp.eq.s32.totalorder %v1762_v3, %v2165_v16 }
 0x293   : > { %v1022_v49 = vadd.f32 %v1020_v9, %v2080_v6  ;;  %v994_v39 = vsel %vm418_vm2, %v992_v38, -1e+09  ;;  %v993_v51 = vsel %vm417_vm10, %v991_v42, -1e+09  ;;  %v1514_v6 = vpop.eup %1513 }
 0x294   : > { %v1064_v56 = vrot.slane %v1063_v43, 4  ;;  %v998_v41 = vsel %vm464_vm8, %v994_v39, -inf  ;;  %v995_v59 = vsel %vm464_vm8, %v993_v51, -inf  ;;  %v977_v50 = vsel %vm464_vm8, %v1514_v6, 0.0 }
 0x295   : > { %999 = vmax.xlane.f32.xlu0 %v998_v41  ;;  %996 = vmax.xlane.f32.xlu1 %v995_v59  ;;  %v1024_v62 = vsel %vm2048_vm3, %v1022_v49, -1e+09  ;;  %vm2398_vm3 = vcmp.eq.s32.totalorder %v1755_v1, 0 }
 0x296   : > { %v1065_v63 = vadd.f32 %v1064_v56, %v1063_v43  ;;  %v1028_v0 = vsel %vm464_vm8, %v1024_v62, -inf }
 0x298   : > { %v1066_v7 = vrot.slane %v1065_v63, 2 }
 0x299   : > { %981 = vadd.xlane.f32.xlu0 %v980_v10  ;;  %1029 = vmax.xlane.f32.xlu1 %v1028_v0 }
 0x29a   : > { %v1067_v20 = vadd.f32 %v1066_v7, %v1065_v63 }
 0x29c   : > { %v1068_v21 = vrot.slane %v1067_v20, 1 }
 0x29d   : > { %978 = vadd.xlane.f32.xlu1 %v977_v50 }
 0x29e   : > { %v1069_v48 = vadd.f32 %v1068_v21, %v1067_v20 }
 0x2a0   : > { %v1103_v14 = vsel %vm401_vm1, %v1069_v48, %v1825_v11  ;;  %v1104_v32 = vsel %vm402_vm11, %v1069_v48, %v1827_v12 }
 0x2a1   : > { %v1105_v22 = vsel %vm1856_vm6, %v2105_v15, %v1103_v14  ;;  %v1106_v37 = vsel %vm1862_vm7, %v960_v35, %v1104_v32 }
 0x2a2   : > { %1107 = vst.msk [vmem:[#allocation2] sm:$0xff] %vm464_vm8, %v1105_v22  ;;  %1108 = vst.msk [vmem:[#allocation2 + $0x8] sm:$0xff] %vm464_vm8, %v1106_v37 }
 0x31c   : > { %v2187_v25 = vpop.xlane.xlu0 %1026 }
 0x31d   : > { %v1031_v11 = vsub.f32 %v1023_v58, %v2187_v25 }
 0x31f   : > { %v1033_v52 = vmul.f32 1.442695, %v1031_v11 }
 0x321   : > { %1515 = vpow2.f32 %v1033_v52  ;;  %v1051_v52 = vstv %s1050_s1 }
 0x322   : > { %v2190_v26 = vpop.xlane.xlu0 %999  ;;  %v2192_v12 = vpop.xlane.xlu1 %996  ;;  %vm1052_vm4 = vcmp.eq.s32.totalorder %v1051_v52, 1 }
 0x323   : > { %v1002_v27 = vsub.f32 %v994_v39, %v2190_v26  ;;  %v1001_v15 = vsub.f32 %v993_v51, %v2192_v12  ;;  %vm1053_vm5 = vmand %vm2398_vm3, %vm1052_vm4 }
 0x325   : > { %v1005_v5 = vmul.f32 1.442695, %v1002_v27  ;;  %v1003_v55 = vmul.f32 1.442695, %v1001_v15 }
 0x326   : > { %v982_v28 = vpop.xlane.xlu0 %981  ;;  %v2196_v31 = vpop.xlane.xlu1 %1029 }
 0x327   : > { %1517 = vpow2.f32 %v1005_v5  ;;  %v1032_v30 = vsub.f32 %v1024_v62, %v2196_v31 }
 0x328   : > { %1519 = vpow2.f32 %v1003_v55 }
 0x329   : > { %1521 = vlog2.f32 %v982_v28  ;;  %v1035_v58 = vmul.f32 1.442695, %v1032_v30 }
 0x32a   : > { %v979_v53 = vpop.xlane.xlu1 %978 }
 0x32b   : > { %v1516_v47 = vpop.eup %1515  ;;  %1523 = vpow2.f32 %v1035_v58 }
 0x32c   : > { %1525 = vlog2.f32 %v979_v53  ;;  %v1037_v4 = vsel %vm464_vm8, %v1516_v47, 0.0 }
 0x32d   : > { %1038 = vadd.xlane.f32.xlu0 %v1037_v4 }
 0x331   : > { %v1518_v35 = vpop.eup %1517 }
 0x332   : > { %v1520_v36 = vpop.eup %1519  ;;  %v1010_v38 = vsel %vm464_vm8, %v1518_v35, 0.0 }
 0x333   : > { %v1522_v42 = vpop.eup %1521  ;;  %1011 = vadd.xlane.f32.xlu0 %v1010_v38  ;;  %v1007_v43 = vsel %vm464_vm8, %v1520_v36, 0.0 }
 0x334   : > { %v986_v9 = vmul.f32 0.6931472, %v1522_v42  ;;  %1008 = vadd.xlane.f32.xlu1 %v1007_v43 }
 0x335   : > { %v1524_v49 = vpop.eup %1523 }
 0x336   : > { %v1526_v39 = vpop.eup %1525  ;;  %v988_v51 = vadd.f32 %v986_v9, %v2097_v57  ;;  %v1040_v56 = vsel %vm464_vm8, %v1524_v49, 0.0 }
 0x337   : > { %v984_v41 = vmul.f32 0.6931472, %v1526_v39 }
 0x338   : > { %1041 = vadd.xlane.f32.xlu1 %v1040_v56  ;;  %v1071_v59 = vsel %vm1058_vm9, %v988_v51, 0.0 }
 0x339   : > { %v987_v60 = vadd.f32 %v984_v41, %v2101_v46  ;;  %v1073_v63 = vsel %vm464_vm8, %v1071_v59, 0.0 }
 0x33b   : > { %v1070_v62 = vsel %vm1057_vm15, %v987_v60, 0.0 }
 0x33c   : > { %v1072_v0 = vsel %vm464_vm8, %v1070_v62, 0.0 }
 0x33d   : > { %v1074_v57 = vadd.f32 %v1073_v63, %v1072_v0 }
 0x33f   : > { %v1075_v7 = vrot.slane %v1074_v57, 4 }
 0x341   : > { %v1076_v10 = vadd.f32 %v1075_v7, %v1074_v57 }
 0x343   : > { %v1077_v6 = vrot.slane %v1076_v10, 2 }
 0x345   : > { %v1078_v20 = vadd.f32 %v1077_v6, %v1076_v10  ;;  %v1131_v10 = vadd.s32 %v1986_v54, %v1757_v2 }
 0x347   : > { %v1079_v21 = vrot.slane %v1078_v20, 1  ;;  %vm1133_vm14 = vcmp.eq.s32.totalorder %v1762_v3, %v1131_v10 }
 0x349   : > { %v1080_v50 = vadd.f32 %v1079_v21, %v1078_v20  ;;  %v1127_v21 = vadd.s32 1, %v1842_v18 }
 0x34b   : > { %v1109_v46 = vsel %vm401_vm1, %v1080_v50, %v1829_v13  ;;  %v1110_v48 = vsel %vm402_vm11, %v1080_v50, %v1838_v17  ;;  %v1128_v50 = vadd.s32 1, %v1846_v19 }
 0x34c   : > { %v1111_v14 = vsel %vm1856_vm6, %v987_v60, %v1109_v46  ;;  %v1112_v32 = vsel %vm1862_vm7, %v988_v51, %v1110_v48 }
 0x34d   : > { %1113 = vst.msk [vmem:[#allocation3] sm:$0xff] %vm464_vm8, %v1111_v14  ;;  %1114 = vst.msk [vmem:[#allocation3 + $0x8] sm:$0xff] %vm464_vm8, %v1112_v32  ;;  %vm1130_vm2 = vcmp.eq.s32.totalorder %v1757_v2, %v1128_v50 }
 0x3ba   : > { %v1039_v22 = vpop.xlane.xlu0 %1038 }
 0x3bb   : > { %1527 = vlog2.f32 %v1039_v22 }
 0x3c0   : > { %v1012_v37 = vpop.xlane.xlu0 %1011 }
 0x3c1   : > { %1529 = vlog2.f32 %v1012_v37  ;;  %v1009_v13 = vpop.xlane.xlu1 %1008 }
 0x3c2   : > { %1531 = vlog2.f32 %v1009_v13 }
 0x3c5   : > { %v1528_v11 = vpop.eup %1527  ;;  %v1042_v17 = vpop.xlane.xlu1 %1041 }
 0x3c6   : > { %1533 = vlog2.f32 %v1042_v17  ;;  %v1044_v27 = vmul.f32 0.6931472, %v1528_v11 }
 0x3c8   : > { %v1047_v55 = vadd.f32 %v1044_v27, %v2187_v25 }
 0x3ca   : > { %v1055_v4 = vsel %vm1053_vm5, -1e+09, %v1047_v55 }
 0x3cb   : > { %v1530_v15 = vpop.eup %1529  ;;  %v1092_v39 = vsel %vm1057_vm15, %v1055_v4, 0.0 }
 0x3cc   : > { %v1532_v5 = vpop.eup %1531  ;;  %v1016_v28 = vmul.f32 0.6931472, %v1530_v15  ;;  %v1094_v59 = vsel %vm464_vm8, %v1092_v39, 0.0 }
 0x3cd   : > { %v1014_v30 = vmul.f32 0.6931472, %v1532_v5 }
 0x3ce   : > { %v2233_v58 = vadd.f32 %v1016_v28, %v2190_v26 }
 0x3cf   : > { %v1017_v53 = vadd.f32 %v1014_v30, %v2192_v12 }
 0x3d0   : > { %v1534_v47 = vpop.eup %1533  ;;  %v1082_v35 = vsel %vm1058_vm9, %v2233_v58, 0.0  ;;  %v1135_v25 = vsel %vm2399_vm12, %v2233_v58, 0.0 }
 0x3d1   : > { %v1084_v36 = vsel %vm464_vm8, %v1082_v35, 0.0  ;;  %v1137_v38 = vsel %vm464_vm8, %v1135_v25, 0.0  ;;  %v1081_v26 = vsel %vm1057_vm15, %v1017_v53, 0.0  ;;  %v1134_v12 = vsel %vm2400_vm13, %v1017_v53, 0.0 }
 0x3d2   : > { %v1083_v42 = vsel %vm464_vm8, %v1081_v26, 0.0  ;;  %v1136_v43 = vsel %vm464_vm8, %v1134_v12, 0.0  ;;  %v1046_v9 = vmul.f32 0.6931472, %v1534_v47  ;;  %vm1129_vm15 = vcmp.eq.s32.totalorder %v1757_v2, %v1127_v21 }
 0x3d3   : > { %v1085_v49 = vadd.f32 %v1084_v36, %v1083_v42  ;;  %v1138_v8 = vadd.f32 %v1137_v38, %v1136_v43 }
 0x3d4   : > { %v1048_v51 = vadd.f32 %v1046_v9, %v2196_v31 }
 0x3d5   : > { %v1086_v56 = vrot.slane %v1085_v49, 4  ;;  %v1139_v41 = vrot.slane %v1138_v8, 4 }
 0x3d6   : > { %v1093_v61 = vsel %vm1058_vm9, %v1048_v51, 0.0  ;;  %vm1132_vm9 = vcmp.eq.s32.totalorder %v1755_v1, %v1131_v10 }
 0x3d7   : > { %v1087_v60 = vadd.f32 %v1086_v56, %v1085_v49  ;;  %v1140_v62 = vadd.f32 %v1139_v41, %v1138_v8  ;;  %v1095_v63 = vsel %vm464_vm8, %v1093_v61, 0.0 }
 0x3d8   : > { %v1096_v0 = vadd.f32 %v1095_v63, %v1094_v59 }
 0x3d9   : > { %v1088_v57 = vrot.slane %v1087_v60, 2  ;;  %v1141_v7 = vrot.slane %v1140_v62, 2 }
 0x3da   : > { %v1097_v6 = vrot.slane %v1096_v0, 4 }
 0x3db   : > { %v1089_v31 = vadd.f32 %v1088_v57, %v1087_v60  ;;  %v1142_v20 = vadd.f32 %v1141_v7, %v1140_v62 }
 0x3dc   : > { %v1098_v46 = vadd.f32 %v1097_v6, %v1096_v0 }
 0x3dd   : > { %v1090_v48 = vrot.slane %v1089_v31, 1  ;;  %v1143_v14 = vrot.slane %v1142_v20, 1 }
 0x3de   : > { %v1099_v32 = vrot.slane %v1098_v46, 2 }
 0x3df   : > { %v1091_v22 = vadd.f32 %v1090_v48, %v1089_v31  ;;  %v1144_v37 = vadd.f32 %v1143_v14, %v1142_v20 }
 0x3e0   : > { %v1100_v54 = vadd.f32 %v1099_v32, %v1098_v46 }
 0x3e1   : > { %v1115_v18 = vsel %vm401_vm1, %v1091_v22, %v1876_v33  ;;  %v1116_v19 = vsel %vm402_vm11, %v1091_v22, %v1878_v34  ;;  %v1145_v13 = vsel %vm1132_vm9, %v1144_v37, %v2042_v40  ;;  %v1146_v11 = vsel %vm1133_vm14, %v1144_v37, %v2027_v29 }
 0x3e2   : > { %v1117_v17 = vsel %vm1856_vm6, %v1055_v4, %v1115_v18  ;;  %v1147_v52 = vsel %vm1129_vm15, %v1055_v4, %v1145_v13  ;;  %v1101_v2 = vrot.slane %v1100_v54, 1  ;;  %v1118_v27 = vsel %vm1862_vm7, %v1048_v51, %v1116_v19 }
 0x3e3   : > { %1119 = vst.msk [vmem:[#allocation4] sm:$0xff] %vm464_vm8, %v1117_v17  ;;  %1149 = vst.msk [vmem:[#allocation6] sm:$0xff] %vm464_vm8, %v1147_v52  ;;  %v1148_v33 = vsel %vm1130_vm2, %v1048_v51, %v1146_v11 }
 0x3e4   : > { %1120 = vst.msk [vmem:[#allocation4 + $0x8] sm:$0xff] %vm464_vm8, %v1118_v27  ;;  %v1102_v34 = vadd.f32 %v1101_v2, %v1100_v54  ;;  %1150 = vst.msk [vmem:[#allocation6 + $0x8] sm:$0xff] %vm464_vm8, %v1148_v33 }
 0x3e6   : > { %v1121_v29 = vsel %vm401_vm1, %v1102_v34, %v1905_v44  ;;  %v1122_v40 = vsel %vm402_vm11, %v1102_v34, %v1907_v45 }
 0x3e7   : > { %v1123_v15 = vsel %vm1856_vm6, %v1017_v53, %v1121_v29  ;;  %v1124_v5 = vsel %vm1862_vm7, %v2233_v58, %v1122_v40 }
 0x3e8   : > { %1125 = vst.msk [vmem:[#allocation5] sm:$0xff] %vm464_vm8, %v1123_v15  ;;  %1126 = vst.msk [vmem:[#allocation5 + $0x8] sm:$0xff] %vm464_vm8, %v1124_v5 }
 0x3e9 PF: > { %p1318_p12 = scmp.ne.s32.totalorder %s1627_s25, 14 }
 0x3ea   : > { %v1155_v1 = vld [vmem:[#allocation4] sm:$0x1] (!%p1318_p12)  ;;  %vm1156_vm0 = vcmask (!%p1318_p12), 122880  }
 0x3eb   : > { %1154 = sbr.rel (%p1318_p12) target bundleno = 1010 (0x3f2), region = 48  ;;  %1157 = vst.msk [vmem:[%s1800_s17] sm:$0x1] (!%p1318_p12), %vm1156_vm0, %v1155_v1 }
 0x3f2 PF: > { %s1319_s2 = sshll.u32 %s1631_s26, 4  ;;  %s1171_s7 = sshll.u32 %s1800_s17, 4  ;;  %s1172_s7 = int_to_ptr.vmem [resolvable:$true] %s1171_s7 }
 0x3f3   : > { %s2310_s28 = scalar_lea.hbm %s2365_s5, %s1319_s2  ;;  %s2401_s8 = sand.u32 1, %s1619_s24  }
 0x3f4   : > { %s1159_s25 = scalar_lea.sflag [#allocation10], %s2401_s8  ;;  %s1547_s13 = scalar_lea.vmem %s1172_s7, 16 }
 0x3f5   : > { %p1548_p13 = scmp.ne.s32.totalorder %s1172_s7, %s1547_s13  ;;  %s1649_s14 = smov [#allocation9]  }
 0x3f6   : > { %s1551_s21 = sshll.u32 %s1649_s14, 4  ;;  %s1552_s21 = int_to_ptr.vmem [resolvable:$false] %s1551_s21 }
 0x3f7   : > { %p1549_p1 = pnand %p1548_p13, %p1732_p8  ;;  %s1553_s6 = scalar_lea.vmem %s1552_s21, 32 }
 0x3f8   : > { %p1554_p3 = scmp.lt.s32.totalorder %s1172_s7, %s1552_s21  ;;  %p1555_p4 = scmp.lt.s32.totalorder %s1553_s6, %s1547_s13 }
 0x3f9   : > { %p1550_p2 = pneg %p1549_p1 }
 0x3fa   : > { %p1556_p5 = por %p1555_p4, %p1554_p3 }
 0x3fc   : > { %p1557_p6 = pnand %p1556_p5, %p1550_p2 }
 0x3fe   : > { %1560 = shalt.err (!%p1557_p6)
}
 0x3ff   : > { %s1561_s26 = scalar_lea.hbm %s2310_s28, 16  ;;  %s1565_s19 = scalar_lea.hbm %s2365_s5, 32 }
 0x400   : > { %p1562_p7 = scmp.ne.s32.totalorder %s2310_s28, %s1561_s26  ;;  %p1566_p11 = scmp.lt.u32.totalorder %s2310_s28, %s2365_s5 }
 0x401   : > { %p1567_p12 = scmp.lt.u32.totalorder %s1565_s19, %s1561_s26  ;;  %p1569_p1 = scmp.lt.u32.totalorder %s1561_s26, %s2310_s28 }
 0x402   : > { %p1563_p9 = pnand %p1562_p7, %p1732_p8 }
 0x403   : > { %p1568_p13 = por %p1567_p12, %p1566_p11 }
 0x404   : > { %p1564_p10 = pneg %p1563_p9 }
 0x405   : > { %p1570_p2 = por %p1569_p1, %p1568_p13 }
 0x407   : > { %p1571_p3 = pnand %p1570_p2, %p1564_p10 }
 0x409   : > { %1574 = shalt.err (!%p1571_p3)
}
 0x40a   : > { %1396 = dma.vmem_to_hbm [thread:$0]  (%p1732_p8), %s1172_s7, 16, %s2310_s28, %s1159_s25  }
 0x40b PF: > { %p1402_p4 = scmp.ge.s32.totalorder %s1643_s29, 2  ;;  %s1183_s18 = sand.u32 1, %s1615_s23  }
 0x40c   : > { %s1184_s30 = scalar_lea.sflag [#allocation10], %s1183_s18 }
 0x40d   : > { %p1399_p5 = pnand %p1402_p4, %p1742_p0 }
 0x40f   : > { %1610 = dma.done.wait (!%p1399_p5), %s1184_s30, 16  }
 0x410   : > { %1612 = vsyncadd (!%p1399_p5), %s1184_s30, 4294967280  ;;  %s24_s29 = sadd.s32 1, %s1643_s29   ;;  %s2402_s16 = sld [smem:[#allocation13_spill]] }
 0x411   : > { %p21_p6 = scmp.ge.s32.totalorder %s24_s29, 32   ;;  %s2403_s0 = sld [smem:[#allocation18_spill]] }
 0x412   : > { %s2404_s25 = sld [smem:[#allocation14_spill]]  ;;  %s2405_s26 = sld [smem:[#allocation15_spill]] }
 0x413   : > { %s2406_s27 = sld [smem:[#allocation16_spill]]  ;;  %s2407_s28 = sld [smem:[#allocation17_spill]] }
 0x414   : > { %s2408_s23 = smov %s1619_s24  ;;  %23 = sbr.rel (!%p21_p6) target bundleno = 21 (0x15), region = 92 }
 0x416   : > { %s2409_s24 = smov %s2402_s16 }
 0x41b   :  { %1188 = vsyncpa [#allocation10], 1 }
 0x41c   :  { %1190 = vsyncpa [#allocation10 + $0x1], 1 }

</bundles_post_ra>
